<compile_context>
chip_gen: v6e
topology: v6e:2x2x1
jax: 0.10.0
libtpu: 0.0.40
codegen_flags: <defaults>
</compile_context>

<pallas_src>
import math

import jax
import jax.numpy as jnp
from jax.experimental import pallas as pl
from jax.experimental.pallas import tpu as pltpu

IN_FEATURES = 24
OUT_FEATURES = 3 * 48 * 24  # 3456
TM_DEFAULT = 1024           # <= 1024 keeps the double-buffered output tile
                            # inside v7x's 64 MiB physical VMEM


def _round_up(v, m):
    return ((v + m - 1) // m) * m


def _linear_kernel(x_ref, w_ref, b_ref, o_ref):
    """One (TM, 3456) output tile of y = x @ Wt + b.

    x_ref: (TM, 24), w_ref: (24, 3456) [pre-transposed, lane-dense],
    b_ref: (1, 3456), o_ref: (TM, 3456).
    """
    acc = jnp.dot(x_ref[...], w_ref[...], preferred_element_type=jnp.float32)
    o_ref[...] = (acc + b_ref[...]).astype(o_ref.dtype)   # bias broadcasts over rows


def nora_v1_forward(x, weight, bias, *, tm=TM_DEFAULT, out_dtype=jnp.float32):
    """Pallas implementation of NoraV1.forward.

    Args:
      x:      any shape whose total size is a multiple of 24 (torch .view(-1, 24))
      weight: (OUT_FEATURES, IN_FEATURES)  -- PyTorch nn.Linear convention
      bias:   (OUT_FEATURES,)
      tm:     max rows per output tile (multiple of 8)
      out_dtype: jnp.float32 (reference-exact, default) or jnp.bfloat16
                 (halves the HBM writeback that dominates this kernel)
    Returns:
      (M, 3, 48, 24) array of out_dtype, M = x.size // 24
    """
    x2d = jnp.reshape(x, (-1, IN_FEATURES)).astype(jnp.float32)
    m = x2d.shape[0]
    tm = max(8, (int(tm) // 8) * 8)

    # --- Tile / grid selection ---------------------------------------------
    # Even number of equal tiles (balanced across v7x's 2 TensorCores), each
    # tile <= tm, tile a multiple of 8 (sublane-aligned stores), and M padded
    # up to a multiple of the tile so the last grid step is never ragged: no
    # masked output DMA, no reads of x rows beyond the (zero-)padded region.
    m8 = _round_up(m, 8)
    n_tiles = 2 * max(1, pl.cdiv(m8, 2 * tm))
    tm_eff = _round_up(pl.cdiv(m8, n_tiles), 8)
    m_pad = tm_eff * n_tiles
    if m_pad != m:
        x2d = jnp.pad(x2d, ((0, m_pad - m), (0, 0)))

    # One-time transpose outside the kernel: (3456, 24) -> (24, 3456), lane-dense.
    wt = jnp.transpose(weight).astype(jnp.float32)
    b2d = jnp.reshape(bias, (1, OUT_FEATURES)).astype(jnp.float32)

    out_bytes = jnp.dtype(out_dtype).itemsize
    cost = pl.CostEstimate(
        flops=2 * m_pad * IN_FEATURES * OUT_FEATURES,
        transcendentals=0,
        bytes_accessed=(m_pad * IN_FEATURES * 4
                        + OUT_FEATURES * IN_FEATURES * 4
                        + OUT_FEATURES * 4
                        + m_pad * OUT_FEATURES * out_bytes),
    )

    def make_call(single_buffer_consts):
        # Resident operands (constant index_map): single-buffer when supported.
        resident_kw = (
            dict(pipeline_mode=pl.Buffered(1)) if single_buffer_consts else {}
        )
        return pl.pallas_call(
            _linear_kernel,
            out_shape=jax.ShapeDtypeStruct((m_pad, OUT_FEATURES), out_dtype),
            grid=(n_tiles,),
            in_specs=[
                # x: tiled along M.
                pl.BlockSpec((tm_eff, IN_FEATURES), lambda i: (i, 0)),
                # Wt: fetched once, resident across all M tiles.
                pl.BlockSpec((IN_FEATURES, OUT_FEATURES), lambda i: (0, 0),
                             **resident_kw),
                # bias: resident.
                pl.BlockSpec((1, OUT_FEATURES), lambda i: (0, 0),
                             **resident_kw),
            ],
            out_specs=pl.BlockSpec((tm_eff, OUT_FEATURES), lambda i: (i, 0)),
            compiler_params=pltpu.CompilerParams(
                # Rows are independent; shards tiles across both TCs on v7x,
                # harmless on single-TC v5e/v6e.
                dimension_semantics=("parallel",),
                # TM=1024 f32 output double-buffer is 27 MiB; raise the scoped
                # limit above the 16/32 MiB defaults (still < v7x's 64 MiB).
                vmem_limit_bytes=48 * 1024 * 1024,
            ),
            cost_estimate=cost,
        )

    try:
        y = make_call(True)(x2d, wt, b2d)
    except Exception:
        # pipeline_mode=pl.Buffered(1) not accepted by this jax/Mosaic version;
        # fall back to default buffering of the (tiny) resident operands.
        y = make_call(False)(x2d, wt, b2d)

    if m_pad != m:
        y = y[:m]
    return jnp.reshape(y, (-1, 3, 48, IN_FEATURES))


def init_params(key):
    """Deterministic init matching nn.Linear's default U(-1/sqrt(fan_in), 1/sqrt(fan_in))."""
    kw, kb = jax.random.split(key)
    bound = 1.0 / math.sqrt(IN_FEATURES)
    weight = jax.random.uniform(
        kw, (OUT_FEATURES, IN_FEATURES), jnp.float32, minval=-bound, maxval=bound
    )
    bias = jax.random.uniform(
        kb, (OUT_FEATURES,), jnp.float32, minval=-bound, maxval=bound
    )
    return weight, bias


def _reference(x, weight, bias):
    x2d = jnp.reshape(x, (-1, IN_FEATURES))
    return (x2d @ weight.T + bias).reshape(-1, 3, 48, IN_FEATURES)


if __name__ == "__main__":
    key = jax.random.PRNGKey(0)
    k_params, k_x1, k_x2 = jax.random.split(key, 3)

    weight, bias = init_params(k_params)

    # Small input: batch=2 rows of 24 features (exercises row padding 2 -> 16
    # and the balanced 2-tile grid).
    x_small = jax.random.normal(k_x1, (2, IN_FEATURES), jnp.float32)
    out_small = jax.block_until_ready(nora_v1_forward(x_small, weight, bias))
    ref_small = _reference(x_small, weight, bias)
    assert out_small.shape == (2, 3, 48, 24), out_small.shape
    assert jnp.allclose(out_small, ref_small, atol=1e-4, rtol=1e-4), "mismatch (small)"

    # Larger input (520 rows): exercises the equal-tile grid (2 tiles of 264 rows).
    x_big = jax.random.normal(k_x2, (520, IN_FEATURES), jnp.float32)
    out_big = jax.block_until_ready(nora_v1_forward(x_big, weight, bias))
    ref_big = _reference(x_big, weight, bias)
    assert out_big.shape == (520, 3, 48, 24), out_big.shape
    assert jnp.allclose(out_big, ref_big, atol=1e-4, rtol=1e-4), "mismatch (tiled)"

    print("KERNEL_OK")
</pallas_src>

<mosaic_0001>
module attributes {stable_mosaic.version = 11 : i64} {
  func.func @_linear_kernel(%arg0: i32, %arg1: memref<8x24xf32, #tpu.memory_space<vmem>>, %arg2: memref<24x3456xf32, #tpu.memory_space<vmem>>, %arg3: memref<1x3456xf32, #tpu.memory_space<vmem>>, %arg4: memref<8x3456xf32, #tpu.memory_space<vmem>>) attributes {dimension_semantics = [#tpu.dimension_semantics<parallel>], iteration_bounds = array<i64: 2>, scalar_prefetch = 0 : i64, scratch_operands = 0 : i64, tpu.core_type = #tpu.core_type<tc>, window_params = [{transform_indices = @transform_0, window_bounds = array<i64: 8, 24>}, {pipeline_mode = #tpu.pipeline_mode<synchronous>, transform_indices = @transform_1, window_bounds = array<i64: 24, 3456>}, {pipeline_mode = #tpu.pipeline_mode<synchronous>, transform_indices = @transform_2, window_bounds = array<i64: 1, 3456>}, {transform_indices = @transform_3, window_bounds = array<i64: 8, 3456>}]} {
    %c0 = arith.constant 0 : index
    %c0_0 = arith.constant 0 : index
    %0 = vector.load %arg1[%c0, %c0_0] : memref<8x24xf32, #tpu.memory_space<vmem>>, vector<8x24xf32>
    %c0_1 = arith.constant 0 : index
    %c0_2 = arith.constant 0 : index
    %1 = vector.load %arg2[%c0_1, %c0_2] : memref<24x3456xf32, #tpu.memory_space<vmem>>, vector<24x3456xf32>
    %cst = arith.constant dense<0.000000e+00> : vector<8x3456xf32>
    %2 = tpu.matmul %0, %1, %cst {dimension_numbers = #tpu.dot_dimension_numbers<[1], [0], [0], [1], [0, 0, 1, 1], [], []>} : vector<8x24xf32>, vector<24x3456xf32>, vector<8x3456xf32> -> vector<8x3456xf32>
    %c0_3 = arith.constant 0 : index
    %c0_4 = arith.constant 0 : index
    %3 = vector.load %arg3[%c0_3, %c0_4] : memref<1x3456xf32, #tpu.memory_space<vmem>>, vector<1x3456xf32>
    %4 = vector.broadcast %3 : vector<1x3456xf32> to vector<8x3456xf32>
    %5 = arith.addf %2, %4 : vector<8x3456xf32>
    %c0_5 = arith.constant 0 : index
    %c0_6 = arith.constant 0 : index
    %6 = vector.load %arg4[%c0_5, %c0_6] : memref<8x3456xf32, #tpu.memory_space<vmem>>, vector<8x3456xf32>
    tpu.vector_store %arg4[%c0_5, %c0_6], %5 {strides = array<i32>} : memref<8x3456xf32, #tpu.memory_space<vmem>>, vector<8x3456xf32>,
    return
  }
  func.func @transform_0(%arg0: i32) -> (i32, i32) {
    %c0_i32 = arith.constant 0 : i32
    %c0_i32_0 = arith.constant 0 : i32
    return %arg0, %c0_i32 : i32, i32
  }
  func.func @transform_1(%arg0: i32) -> (i32, i32) {
    %c0_i32 = arith.constant 0 : i32
    %c0_i32_0 = arith.constant 0 : i32
    %c0_i32_1 = arith.constant 0 : i32
    return %c0_i32, %c0_i32_0 : i32, i32
  }
  func.func @transform_2(%arg0: i32) -> (i32, i32) {
    %c0_i32 = arith.constant 0 : i32
    %c0_i32_0 = arith.constant 0 : i32
    %c0_i32_1 = arith.constant 0 : i32
    return %c0_i32, %c0_i32_0 : i32, i32
  }
  func.func @transform_3(%arg0: i32) -> (i32, i32) {
    %c0_i32 = arith.constant 0 : i32
    %c0_i32_0 = arith.constant 0 : i32
    return %arg0, %c0_i32 : i32, i32
  }
}

module attributes {stable_mosaic.version = 11 : i64} {
  func.func @_linear_kernel(%arg0: i32, %arg1: memref<8x24xf32, #tpu.memory_space<vmem>>, %arg2: memref<24x3456xf32, #tpu.memory_space<vmem>>, %arg3: memref<1x3456xf32, #tpu.memory_space<vmem>>, %arg4: memref<8x3456xf32, #tpu.memory_space<vmem>>) attributes {dimension_semantics = [#tpu.dimension_semantics<parallel>], iteration_bounds = array<i64: 2>, scalar_prefetch = 0 : i64, scratch_operands = 0 : i64, tpu.core_type = #tpu.core_type<tc>, window_params = [{transform_indices = @transform_0, window_bounds = array<i64: 8, 24>}, {pipeline_mode = #tpu.pipeline_mode<synchronous>, transform_indices = @transform_1, window_bounds = array<i64: 24, 3456>}, {pipeline_mode = #tpu.pipeline_mode<synchronous>, transform_indices = @transform_2, window_bounds = array<i64: 1, 3456>}, {transform_indices = @transform_3, window_bounds = array<i64: 8, 3456>}]} {
    %c0 = arith.constant 0 : index
    %c0_0 = arith.constant 0 : index
    %0 = vector.load %arg1[%c0, %c0_0] : memref<8x24xf32, #tpu.memory_space<vmem>>, vector<8x24xf32>
    %c0_1 = arith.constant 0 : index
    %c0_2 = arith.constant 0 : index
    %1 = vector.load %arg2[%c0_1, %c0_2] : memref<24x3456xf32, #tpu.memory_space<vmem>>, vector<24x3456xf32>
    %cst = arith.constant dense<0.000000e+00> : vector<8x3456xf32>
    %2 = tpu.matmul %0, %1, %cst {dimension_numbers = #tpu.dot_dimension_numbers<[1], [0], [0], [1], [0, 0, 1, 1], [], []>} : vector<8x24xf32>, vector<24x3456xf32>, vector<8x3456xf32> -> vector<8x3456xf32>
    %c0_3 = arith.constant 0 : index
    %c0_4 = arith.constant 0 : index
    %3 = vector.load %arg3[%c0_3, %c0_4] : memref<1x3456xf32, #tpu.memory_space<vmem>>, vector<1x3456xf32>
    %4 = vector.broadcast %3 : vector<1x3456xf32> to vector<8x3456xf32>
    %5 = arith.addf %2, %4 : vector<8x3456xf32>
    %c0_5 = arith.constant 0 : index
    %c0_6 = arith.constant 0 : index
    %6 = vector.load %arg4[%c0_5, %c0_6] : memref<8x3456xf32, #tpu.memory_space<vmem>>, vector<8x3456xf32>
    tpu.vector_store %arg4[%c0_5, %c0_6], %5 {strides = array<i32>} : memref<8x3456xf32, #tpu.memory_space<vmem>>, vector<8x3456xf32>,
    return
  }
  func.func @transform_0(%arg0: i32) -> (i32, i32) {
    %c0_i32 = arith.constant 0 : i32
    %c0_i32_0 = arith.constant 0 : i32
    return %arg0, %c0_i32 : i32, i32
  }
  func.func @transform_1(%arg0: i32) -> (i32, i32) {
    %c0_i32 = arith.constant 0 : i32
    %c0_i32_0 = arith.constant 0 : i32
    %c0_i32_1 = arith.constant 0 : i32
    return %c0_i32, %c0_i32_0 : i32, i32
  }
  func.func @transform_2(%arg0: i32) -> (i32, i32) {
    %c0_i32 = arith.constant 0 : i32
    %c0_i32_0 = arith.constant 0 : i32
    %c0_i32_1 = arith.constant 0 : i32
    return %c0_i32, %c0_i32_0 : i32, i32
  }
  func.func @transform_3(%arg0: i32) -> (i32, i32) {
    %c0_i32 = arith.constant 0 : i32
    %c0_i32_0 = arith.constant 0 : i32
    return %arg0, %c0_i32 : i32, i32
  }
}

</mosaic_0001>

<bundles_post_ra>
// kernel: tpu_custom_call.1
= control target key start
LH: loop header
LB: loop body
LE: loop exit
PB: predicated region body
PF: predicated region fallthrough
CT: control target
= control target key end

     0   :  { %8 = vsyncpa [#allocation3], 0  ;;  %s2144_s0 = inlined_call_operand.hbm [shape: f32[16,24], index: 0, kind: input, shape index: {}]   ;;  %s2145_s1 = inlined_call_operand.hbm [shape: f32[24,3456], index: 1, kind: input, shape index: {}]   ;;  %s2146_s2 = inlined_call_operand.hbm [shape: f32[1,3456], index: 2, kind: input, shape index: {}]   ;;  %s2147_s3 = inlined_call_operand.hbm [shape: f32[16,3456], index: 3, kind: output, shape index: {}]  }
   0x1   :  { %10 = vsyncpa [#allocation3 + $0x1], 0 }
   0x2   :  { %11 = vsyncpa [#allocation6], 0 }
   0x3   :  { %12 = vsyncpa [#allocation4], 0 }
   0x4   :  { %14 = vsyncpa [#allocation4 + $0x1], 0  ;;  %s1858_s12 = smov 0   ;;  %s1860_s13 = smov 0  }
   0x5   :  { %s1862_s14 = smov 0   ;;  %s1864_s15 = smov 0  }
   0x6 LB: > { %s1879_s16 = sadd.s32 4294967295, %s1828_s15   ;;  %s1566_s17 = sadd.s32 4294967294, %s1828_s15   ;;  %s1828_s15 = sphi %s1864_s15, %s2169_s15   ;;  %s1824_s14 = sphi %s1862_s14, %s2168_s14   ;;  %s1820_s13 = sphi %s1860_s13, %s2167_s13   ;;  %s1816_s12 = sphi %s1858_s12, %s2166_s12  }
   0x7   : > { %p40_p0 = scmp.ne.s32.totalorder %s1820_s13, %s1816_s12  ;;  %p2148_p1 = scmp.eq.s32.totalorder %s1879_s16, 0 }
   0x8   : > { %p112_p3 = scmp.eq.s32.totalorder %s1566_s17, 1  ;;  %p1567_p5 = scmp.ge.s32.totalorder %s1828_s15, 1 }
   0x9   : > { %p1888_p4 = por %p2148_p1, %p40_p0  ;;  %p119_p7 = scmp.lt.s32.totalorder %s1828_s15, 3 }
   0xa   : > { %p1893_p6 = por %p112_p3, %p40_p0  ;;  %s1830_s21 = smov [#allocation5]  }
   0xb   : > { %s2152_s18 = scalar_select %p1888_p4, 1, 0 }
   0xc   : > { %s2153_s19 = scalar_select %p1893_p6, 1, 0 }
   0xd   : > { %p1898_p8 = pnand %p1567_p5, %p119_p7  ;;  %s131_s22 = sshll.u32 %s1830_s21, 4  ;;  %s132_s22 = int_to_ptr.vmem [resolvable:$true] %s131_s22 }
   0xe   : > { %s1831_s24 = smov [#allocation7]   ;;  %s1691_s26 = scalar_lea.vmem %s132_s22, 10368 }
   0xf   : > { %s2154_s20 = scalar_select %p1898_p8, 1, 0 }
  0x10   : > { %p1621_p9 = pneg %p1898_p8  ;;  %s145_s25 = sshll.u32 %s1831_s24, 4  ;;  %s146_s25 = int_to_ptr.vmem [resolvable:$true] %s145_s25 }
  0x11   : > { %p1692_p13 = scmp.ne.s32.totalorder %s132_s22, %s1691_s26  ;;  %p1699_p5 = scmp.lt.s32.totalorder %s132_s22, %s132_s22 }
  0x12   : > { %p1907_p11 = pnand %p1621_p9, %p2148_p1  ;;  %p1700_p7 = scmp.lt.s32.totalorder %s1691_s26, %s1691_s26 }
  0x14   : > { %p1682_p12 = pneg %p1907_p11  ;;  %p1701_p10 = por %p1700_p7, %p1699_p5 }
  0x16   : > { %p1694_p0 = pnand %p1692_p13, %p1682_p12 }
  0x18   : > { %p1695_p3 = pneg %p1694_p0 }
  0x1a   : > { %p1702_p9 = pnand %p1701_p10, %p1695_p3 }
  0x1c   : > { %1705 = shalt.err (!%p1702_p9)
}
  0x1d   : > { %s1832_s27 = smov 3456   ;;  %s1833_s28 = smov 216  }
  0x1e   : > { %1624 = dma.hbm_to_vmem [thread:$0]  (!%p1907_p11), %s2145_s1, 10368, %s132_s22, [#allocation6], %s1832_s27, %s1832_s27, %s1833_s28  }
  0x1f   : > { %s1717_s4 = scalar_lea.vmem %s146_s25, 432  ;;  %s1724_s5 = scalar_lea.vmem %s146_s25, 448 }
  0x20   : > { %p1718_p1 = scmp.ne.s32.totalorder %s146_s25, %s1717_s4  ;;  %p1725_p2 = scmp.lt.s32.totalorder %s146_s25, %s146_s25 }
  0x21   : > { %p1726_p5 = scmp.lt.s32.totalorder %s1724_s5, %s1717_s4 }
  0x22   : > { %p1720_p13 = pnand %p1718_p1, %p1682_p12 }
  0x23   : > { %p1727_p10 = por %p1726_p5, %p1725_p2 }
  0x24   : > { %p1721_p0 = pneg %p1720_p13 }
  0x26   : > { %p1728_p3 = pnand %p1727_p10, %p1721_p0 }
  0x28   : > { %1731 = shalt.err (!%p1728_p3)
}
  0x29   : > { %1627 = dma.hbm_to_vmem [thread:$0]  (!%p1907_p11), %s2146_s2, 432, %s146_s25, [#allocation6]  }
  0x2a   : > { %s1930_s8 = sadd.s32 1, %s1828_s15   ;;  %s27_s9 = sadd.s32 1, %s1824_s14 }
  0x2b   : > { %s24_s10 = ssub.s32 %s1828_s15, %s1930_s8  ;;  %p34_p1 = scmp.ne.s32.totalorder %s1824_s14, %s1820_s13 }
  0x2c   : > { %p25_p2 = scmp.eq.s32.totalorder %s24_s10, 0  ;;  %p35_p12 = scmp.eq.s32.totalorder %s1828_s15, 0 }
  0x2d   : > { %p2156_p7 = scmp.eq.s32.totalorder %s1879_s16, 1  ;;  %p1638_p13 = scmp.lt.s32.totalorder %s1828_s15, 2 }
  0x2e   : > { %s1946_s17 = scalar_select %p25_p2, %s1824_s14, %s27_s9  }
  0x2f   : > { %p1940_p9 = por %p2156_p7, %p34_p1  ;;  %p36_p0 = por %p35_p12, %p34_p1 }
  0x30   : > { %s156_s21 = sand.u32 1, %s1824_s14   ;;  %s1572_s23 = sshll.u32 %s1828_s15, 7 }
  0x31   : > { %s2157_s11 = scalar_select %p1940_p9, 1, 0 }
  0x32   : > { %s1571_s22 = sshll.u32 %s156_s21, 3  ;;  %s1953_s26 = scalar_lea.hbm %s2144_s0, %s1572_s23 }
  0x33   : > { %s160_s27 = scalar_lea.vmem [#allocation2], %s1571_s22  ;;  %p1955_p11 = pnand %p1638_p13, %p36_p0 }
  0x34   : > { %s167_s28 = sshll.u32 %s160_s27, 4  ;;  %s157_s30 = scalar_lea.sflag [#allocation3], %s156_s21  ;;  %s168_s28 = int_to_ptr.vmem [resolvable:$true] %s167_s28 }
  0x35   : > { %s1732_s4 = scalar_lea.hbm %s1953_s26, 128  ;;  %p1734_p10 = pneg %p1955_p11 }
  0x36   : > { %p1733_p5 = scmp.ne.s32.totalorder %s1953_s26, %s1732_s4  ;;  %s1737_s7 = scalar_lea.hbm %s2144_s0, 256 }
  0x37   : > { %p1738_p2 = scmp.lt.s32.totalorder %s1953_s26, %s2144_s0  ;;  %p1739_p12 = scmp.lt.s32.totalorder %s1737_s7, %s1732_s4 }
  0x38   : > { %p1735_p3 = pnand %p1734_p10, %p1733_p5 }
  0x39   : > { %p1740_p7 = por %p1739_p12, %p1738_p2 }
  0x3a   : > { %p1736_p1 = pneg %p1735_p3 }
  0x3c   : > { %p1741_p13 = pnand %p1740_p7, %p1736_p1 }
  0x3e   : > { %1744 = shalt.err (!%p1741_p13)
}
  0x3f   : > { %s1745_s22 = scalar_lea.vmem %s168_s28, 128  ;;  %s1834_s21 = smov [#allocation2]  }
  0x40   : > { %p1746_p0 = scmp.ne.s32.totalorder %s168_s28, %s1745_s22  ;;  %s1750_s23 = sshll.u32 %s1834_s21, 4  ;;  %s1751_s23 = int_to_ptr.vmem [resolvable:$false] %s1750_s23 }
  0x41   : > { %s1752_s24 = scalar_lea.vmem %s1751_s23, 256  ;;  %p1753_p5 = scmp.lt.s32.totalorder %s168_s28, %s1751_s23 }
  0x42   : > { %p1748_p6 = pnand %p1746_p0, %p1734_p10  ;;  %p1754_p3 = scmp.lt.s32.totalorder %s1752_s24, %s1745_s22 }
  0x44   : > { %p1749_p9 = pneg %p1748_p6  ;;  %p1755_p4 = por %p1754_p3, %p1753_p5 }
  0x46   : > { %p1756_p8 = pnand %p1755_p4, %p1749_p9 }
  0x48   : > { %1759 = shalt.err (!%p1756_p8)
}
  0x49   : > { %1631 = dma.hbm_to_vmem [thread:$0]  (!%p1955_p11), %s1953_s26, 128, %s168_s28, %s157_s30  }
  0x4a   : > { %p2159_p1 = scmp.ne.s32.totalorder %s2154_s20, 0 }
  0x4b   : > { %s1976_s25 = sand.u32 (!%p2159_p1), 1, %s1820_s13   ;;  %p2160_p6 = scmp.ne.s32.totalorder (!%p2159_p1), %s2152_s18, 0 }
  0x4c   : > { %176 = sbr.rel (%p2159_p1) target bundleno = 351 (0x15f), region = 32  ;;  %s1574_s27 = sshll.u32 (!%p2159_p1), %s1976_s25, 3 }
  0x4d   : > { %s179_s4 = scalar_lea.sflag (!%p2159_p1), [#allocation3], %s1976_s25  ;;  %s182_s5 = scalar_lea.vmem (!%p2159_p1), [#allocation2], %s1574_s27 }
  0x51   : > { %1803 = dma.done.wait (%p2160_p6), %s179_s4, 128  }
  0x52   : > { %1805 = vsyncadd (%p2160_p6), %s179_s4, 4294967168  ;;  %p2161_p4 = scmp.eq.s32.totalorder %s1879_s16, 0 }
  0x54   : > { %1807 = dma.done.wait (%p2161_p4), [#allocation6], 10800   ;;  %p2162_p8 = pmov %p2161_p4 }
  0x55   : > { %v1835_v0 = vmov 0.0   ;;  %v269_v1 = vld [vmem:[#allocation5 + $0x1b8] sm:$0xff]  ;;  %v271_v2 = vld [vmem:[#allocation5 + $0x1c8] sm:$0xff]  ;;  %v268_v3 = vld [vmem:[#allocation5 + $0x1b0] sm:$0xff]  ;;  %vm438_vm0 = vcmask 195584   ;;  %vm1836_vm1 = vmmov 0  }
  0x56   : > { %1809 = vsyncadd (%p2162_p8), [#allocation6], 4294956496  ;;  %506 = vmatprep.mubr.f32.mxu0 %v1835_v0  ;;  %577 = vmatprep.mubr.f32.mxu1 %v1835_v0  ;;  %v270_v4 = vld [vmem:[#allocation5 + $0x1c0] sm:$0xff]  ;;  %v244_v6 = vld [vmem:[#allocation5 + $0xf0] sm:$0xff]  ;;  %s1607_s18 = smul.u32 216, %s1976_s25  ;;  %s1463_s7 = scalar_lea.sflag [#allocation4], %s1976_s25 }
  0x57   : > { %468 = vmatprep.subr.mxu0 %v269_v1  ;;  %539 = vmatprep.subr.mxu1 %v271_v2  ;;  %v242_v5 = vld [vmem:[#allocation5 + $0xe0] sm:$0xff]  ;;  %v241_v7 = vld [vmem:[#allocation5 + $0xd8] sm:$0xff]  ;;  %v243_v8 = vld [vmem:[#allocation5 + $0xe8] sm:$0xff]  ;;  %s1608_s26 = smul.u32 3456, %s1879_s16  ;;  %p2163_p11 = scmp.ne.s32.totalorder %s2157_s11, 0 }
  0x58   : > { %469 = vmatpush1.msra.mxu0 %v268_v3  ;;  %540 = vmatpush1.msra.mxu1 %v270_v4  ;;  %v215_v9 = vld [vmem:[#allocation5 + $0x8] sm:$0xff]  ;;  %v217_v10 = vld [vmem:[#allocation5 + $0x18] sm:$0xff]  ;;  %v214_v11 = vld [vmem:[#allocation5] sm:$0xff]  ;;  %s2054_s20 = scalar_lea.vmem [#allocation8], %s1607_s18  ;;  %s1837_s16 = smov [#allocation8]  }
  0x59   : > { %470 = vmatprep.subr.mxu0 %v242_v5  ;;  %541 = vmatprep.subr.mxu1 %v244_v6  ;;  %v216_v12 = vld [vmem:[#allocation5 + $0x10] sm:$0xff]  ;;  %v273_v14 = vld [vmem:[#allocation5 + $0x1d8] sm:$0xff]  ;;  %v275_v15 = vld [vmem:[#allocation5 + $0x1e8] sm:$0xff]  ;;  %s1477_s28 = sshll.u32 %s2054_s20, 4  ;;  %s1475_s6 = scalar_lea.hbm %s2147_s3, %s1608_s26  ;;  %s1478_s28 = int_to_ptr.vmem [resolvable:$true] %s1477_s28 }
  0x5a   : > { %471 = vmatpush1.msra.mxu0 %v241_v7  ;;  %542 = vmatpush1.msra.mxu1 %v243_v8  ;;  %v1990_v13 = vld [vmem:[%s182_s5] sm:$0xff]  ;;  %v274_v17 = vld [vmem:[#allocation5 + $0x1e0] sm:$0xff]  ;;  %v247_v21 = vld [vmem:[#allocation5 + $0x108] sm:$0xff]  ;;  %s1760_s9 = scalar_lea.vmem %s1478_s28, 3456  ;;  %s1764_s10 = sshll.u32 %s1837_s16, 4  ;;  %s1765_s10 = int_to_ptr.vmem [resolvable:$false] %s1764_s10 }
  0x5b   : > { %472 = vmatprep.subr.mxu0 %v215_v9  ;;  %543 = vmatprep.subr.mxu1 %v217_v10  ;;  %v272_v16 = vld [vmem:[#allocation5 + $0x1d0] sm:$0xff]  ;;  %v246_v18 = vld [vmem:[#allocation5 + $0x100] sm:$0xff]  ;;  %v245_v20 = vld [vmem:[#allocation5 + $0xf8] sm:$0xff]  ;;  %p1761_p9 = scmp.ne.s32.totalorder %s1478_s28, %s1760_s9  ;;  %s1766_s22 = scalar_lea.vmem %s1765_s10, 6912 }
  0x5c   : > { %473 = vmatpush1.msra.mxu0 %v214_v11  ;;  %544 = vmatpush1.msra.mxu1 %v216_v12  ;;  %v248_v19 = vld [vmem:[#allocation5 + $0x110] sm:$0xff]  ;;  %v219_v22 = vld [vmem:[#allocation5 + $0x28] sm:$0xff]  ;;  %v221_v23 = vld [vmem:[#allocation5 + $0x38] sm:$0xff]  ;;  %p1767_p12 = scmp.lt.s32.totalorder %s1478_s28, %s1765_s10  ;;  %p1768_p7 = scmp.lt.s32.totalorder %s1766_s22, %s1760_s9 }
  0x5d   : > { %1577 = vmatmul.mubr.msk.f32.vlgmr.msra.gmra.mxu0 %vm438_vm0, %v1990_v13  ;;  %610 = vmatprep.subr.mxu0 %v273_v14  ;;  %v218_v24 = vld [vmem:[#allocation5 + $0x20] sm:$0xff]  ;;  %v220_v25 = vld [vmem:[#allocation5 + $0x30] sm:$0xff]  ;;  %v277_v26 = vld [vmem:[#allocation5 + $0x1f8] sm:$0xff]  ;;  %p1762_p10 = pnand %p1761_p9, %p2163_p11 }
  0x5e   : > { %681 = vmatprep.subr.mxu1 %v275_v15  ;;  %1578 = vmatmul.mubr.msk.f32.vlgmr.msra.gmra.mxu1 %vm438_vm0, %v1990_v13  ;;  %v279_v27 = vld [vmem:[#allocation5 + $0x208] sm:$0xff]  ;;  %v276_v28 = vld [vmem:[#allocation5 + $0x1f0] sm:$0xff]  ;;  %v278_v29 = vld [vmem:[#allocation5 + $0x200] sm:$0xff]  ;;  %p1769_p13 = por %p1768_p7, %p1767_p12 }
  0x5f   : > { %611 = vmatpush1.msra.mxu0 %v272_v16  ;;  %682 = vmatpush1.msra.mxu1 %v274_v17  ;;  %v250_v30 = vld [vmem:[#allocation5 + $0x120] sm:$0xff]  ;;  %v252_v31 = vld [vmem:[#allocation5 + $0x130] sm:$0xff]  ;;  %v249_v32 = vld [vmem:[#allocation5 + $0x118] sm:$0xff]  ;;  %p1763_p2 = pneg %p1762_p10 }
  0x60   : > { %612 = vmatprep.subr.mxu0 %v246_v18  ;;  %683 = vmatprep.subr.mxu1 %v248_v19  ;;  %v251_v33 = vld [vmem:[#allocation5 + $0x128] sm:$0xff]  ;;  %v225_v35 = vld [vmem:[#allocation5 + $0x58] sm:$0xff]  ;;  %v222_v36 = vld [vmem:[#allocation5 + $0x40] sm:$0xff] }
  0x61   : > { %613 = vmatpush1.msra.mxu0 %v245_v20  ;;  %684 = vmatpush1.msra.mxu1 %v247_v21  ;;  %v223_v34 = vld [vmem:[#allocation5 + $0x48] sm:$0xff]  ;;  %v224_v37 = vld [vmem:[#allocation5 + $0x50] sm:$0xff]  ;;  %v281_v38 = vld [vmem:[#allocation5 + $0x218] sm:$0xff]  ;;  %v303_v21 = vlaneseq  ;;  %p1770_p0 = pnand %p1769_p13, %p1763_p2 }
  0x62   : > { %614 = vmatprep.subr.mxu0 %v219_v22  ;;  %685 = vmatprep.subr.mxu1 %v221_v23  ;;  %v283_v39 = vld [vmem:[#allocation5 + $0x228] sm:$0xff]  ;;  %v280_v40 = vld [vmem:[#allocation5 + $0x210] sm:$0xff]  ;;  %v282_v41 = vld [vmem:[#allocation5 + $0x220] sm:$0xff] }
  0x63   : > { %615 = vmatpush1.msra.mxu0 %v218_v24  ;;  %648 = vmatprep.mubr.f32.mxu0 %v1835_v0  ;;  %v254_v42 = vld [vmem:[#allocation5 + $0x140] sm:$0xff]  ;;  %v256_v43 = vld [vmem:[#allocation5 + $0x150] sm:$0xff]  ;;  %v253_v44 = vld [vmem:[#allocation5 + $0x138] sm:$0xff]  ;;  %v304_v22 = vshrl.u32 %v303_v21, 7 }
  0x64   : > { %686 = vmatpush1.msra.mxu1 %v220_v25  ;;  %1579 = vmatmul.mubr.msk.f32.vlgmr.msra.gmra.mxu0 %vm438_vm0, %v1990_v13  ;;  %v255_v45 = vld [vmem:[#allocation5 + $0x148] sm:$0xff]  ;;  %v229_v47 = vld [vmem:[#allocation5 + $0x78] sm:$0xff]  ;;  %v226_v48 = vld [vmem:[#allocation5 + $0x60] sm:$0xff] }
  0x65   : > { %719 = vmatprep.mubr.f32.mxu1 %v1835_v0  ;;  %752 = vmatprep.subr.mxu0 %v277_v26  ;;  %v227_v46 = vld [vmem:[#allocation5 + $0x68] sm:$0xff]  ;;  %v228_v49 = vld [vmem:[#allocation5 + $0x70] sm:$0xff]  ;;  %v285_v50 = vld [vmem:[#allocation5 + $0x238] sm:$0xff]  ;;  %v2035_v23 = vsub.s32 0, %v304_v22  ;;  %v2037_v25 = vsub.s32 2, %v304_v22  ;;  %v2039_v26 = vsub.s32 1, %v304_v22 }
  0x66   : > { %823 = vmatprep.subr.mxu1 %v279_v27  ;;  %1580 = vmatmul.mubr.msk.f32.vlgmr.msra.gmra.mxu1 %vm438_vm0, %v1990_v13  ;;  %v287_v51 = vld [vmem:[#allocation5 + $0x248] sm:$0xff]  ;;  %v284_v52 = vld [vmem:[#allocation5 + $0x230] sm:$0xff]  ;;  %v286_v53 = vld [vmem:[#allocation5 + $0x240] sm:$0xff]  ;;  %v2042_v27 = vsub.s32 3, %v304_v22 }
  0x67   : > { %753 = vmatpush1.msra.mxu0 %v276_v28  ;;  %824 = vmatpush1.msra.mxu1 %v278_v29  ;;  %v258_v54 = vld [vmem:[#allocation5 + $0x160] sm:$0xff]  ;;  %v260_v55 = vld [vmem:[#allocation5 + $0x170] sm:$0xff]  ;;  %v257_v56 = vld [vmem:[#allocation5 + $0x158] sm:$0xff] }
  0x68   : > { %754 = vmatprep.subr.mxu0 %v250_v30  ;;  %825 = vmatprep.subr.mxu1 %v252_v31  ;;  %v259_v57 = vld [vmem:[#allocation5 + $0x168] sm:$0xff]  ;;  %v233_v59 = vld [vmem:[#allocation5 + $0x98] sm:$0xff]  ;;  %v230_v60 = vld [vmem:[#allocation5 + $0x80] sm:$0xff]  ;;  %v2048_v31 = vsub.s32 4, %v304_v22 }
  0x69   : > { %755 = vmatpush1.msra.mxu0 %v249_v32  ;;  %826 = vmatpush1.msra.mxu1 %v251_v33  ;;  %v231_v58 = vld [vmem:[#allocation5 + $0x88] sm:$0xff]  ;;  %v232_v61 = vld [vmem:[#allocation5 + $0x90] sm:$0xff]  ;;  %v289_v62 = vld [vmem:[#allocation5 + $0x258] sm:$0xff] }
  0x6a   : > { %756 = vmatprep.subr.mxu0 %v223_v34  ;;  %827 = vmatprep.subr.mxu1 %v225_v35  ;;  %v291_v63 = vld [vmem:[#allocation5 + $0x268] sm:$0xff]  ;;  %v288_v1 = vld [vmem:[#allocation5 + $0x250] sm:$0xff]  ;;  %v290_v2 = vld [vmem:[#allocation5 + $0x260] sm:$0xff] }
  0x6b   : > { %757 = vmatpush1.msra.mxu0 %v222_v36  ;;  %790 = vmatprep.mubr.f32.mxu0 %v1835_v0  ;;  %v262_v3 = vld [vmem:[#allocation5 + $0x180] sm:$0xff]  ;;  %v264_v4 = vld [vmem:[#allocation5 + $0x190] sm:$0xff]  ;;  %v261_v5 = vld [vmem:[#allocation5 + $0x178] sm:$0xff]  ;;  %v2050_v36 = vsub.s32 6, %v304_v22 }
  0x6c   : > { %828 = vmatpush1.msra.mxu1 %v224_v37  ;;  %1581 = vmatmul.mubr.msk.f32.vlgmr.msra.gmra.mxu0 %vm438_vm0, %v1990_v13  ;;  %v263_v6 = vld [vmem:[#allocation5 + $0x188] sm:$0xff]  ;;  %v237_v8 = vld [vmem:[#allocation5 + $0xb8] sm:$0xff]  ;;  %v234_v9 = vld [vmem:[#allocation5 + $0xa0] sm:$0xff]  ;;  %v2052_v37 = vsub.s32 5, %v304_v22 }
  0x6d   : > { %861 = vmatprep.mubr.f32.mxu1 %v1835_v0  ;;  %894 = vmatprep.subr.mxu0 %v281_v38  ;;  %v235_v7 = vld [vmem:[#allocation5 + $0xa8] sm:$0xff]  ;;  %v236_v10 = vld [vmem:[#allocation5 + $0xb0] sm:$0xff]  ;;  %v293_v11 = vld [vmem:[#allocation5 + $0x278] sm:$0xff] }
  0x6e   : > { %965 = vmatprep.subr.mxu1 %v283_v39  ;;  %1582 = vmatmul.mubr.msk.f32.vlgmr.msra.gmra.mxu1 %vm438_vm0, %v1990_v13  ;;  %v292_v12 = vld [vmem:[#allocation5 + $0x270] sm:$0xff]  ;;  %v294_v14 = vld [vmem:[#allocation5 + $0x280] sm:$0xff]  ;;  %v265_v16 = vld [vmem:[#allocation5 + $0x198] sm:$0xff] }
  0x6f   : > { %895 = vmatpush1.msra.mxu0 %v280_v40  ;;  %966 = vmatpush1.msra.mxu1 %v282_v41  ;;  %v266_v15 = vld [vmem:[#allocation5 + $0x1a0] sm:$0xff]  ;;  %v267_v17 = vld [vmem:[#allocation5 + $0x1a8] sm:$0xff]  ;;  %v240_v20 = vld [vmem:[#allocation5 + $0xd0] sm:$0xff] }
  0x70   : > { %896 = vmatprep.subr.mxu0 %v254_v42  ;;  %967 = vmatprep.subr.mxu1 %v256_v43  ;;  %v239_v18 = vld [vmem:[#allocation5 + $0xc8] sm:$0xff]  ;;  %v238_v19 = vld [vmem:[#allocation5 + $0xc0] sm:$0xff]  ;;  %v2059_v42 = vsub.s32 7, %v304_v22 }
  0x71   : > { %897 = vmatpush1.msra.mxu0 %v253_v44  ;;  %968 = vmatpush1.msra.mxu1 %v255_v45  ;;  %v295_v24 = vld [vmem:[#allocation7] sm:$0xff] }
  0x72   : > { %898 = vmatprep.subr.mxu0 %v227_v46  ;;  %969 = vmatprep.subr.mxu1 %v229_v47  ;;  %v314_v28 = vrot.slane %v295_v24, %v2037_v25  ;;  %v310_v29 = vrot.slane %v295_v24, %v2039_v26  ;;  %v322_v41 = vrot.slane %v295_v24, %v2048_v31 }
  0x73   : > { %899 = vmatpush1.msra.mxu0 %v226_v48  ;;  %932 = vmatprep.mubr.f32.mxu0 %v1835_v0  ;;  %v330_v43 = vrot.slane %v295_v24, %v2050_v36  ;;  %v326_v44 = vrot.slane %v295_v24, %v2052_v37  ;;  %v334_v47 = vrot.slane %v295_v24, %v2059_v42 }
  0x74   : > { %970 = vmatpush1.msra.mxu1 %v228_v49  ;;  %1583 = vmatmul.mubr.msk.f32.vlgmr.msra.gmra.mxu0 %vm438_vm0, %v1990_v13 }
  0x75   : > { %1003 = vmatprep.mubr.f32.mxu1 %v1835_v0  ;;  %1036 = vmatprep.subr.mxu0 %v285_v50  ;;  %v296_v50 = vld [vmem:[#allocation7 + $0x8] sm:$0xff] }
  0x76   : > { %1107 = vmatprep.subr.mxu1 %v287_v51  ;;  %1584 = vmatmul.mubr.msk.f32.vlgmr.msra.gmra.mxu1 %vm438_vm0, %v1990_v13 }
  0x77   : > { %1037 = vmatpush1.msra.mxu0 %v284_v52  ;;  %1108 = vmatpush1.msra.mxu1 %v286_v53 }
  0x78   : > { %1038 = vmatprep.subr.mxu0 %v258_v54  ;;  %1109 = vmatprep.subr.mxu1 %v260_v55  ;;  %v338_v55 = vrot.slane %v296_v50, %v2035_v23 }
  0x79   : > { %1039 = vmatpush1.msra.mxu0 %v257_v56  ;;  %1110 = vmatpush1.msra.mxu1 %v259_v57  ;;  %v346_v56 = vrot.slane %v296_v50, %v2037_v25  ;;  %v342_v57 = vrot.slane %v296_v50, %v2039_v26 }
  0x7a   : > { %1040 = vmatprep.subr.mxu0 %v231_v58  ;;  %1111 = vmatprep.subr.mxu1 %v233_v59 }
  0x7b   : > { %1041 = vmatpush1.msra.mxu0 %v230_v60  ;;  %1074 = vmatprep.mubr.f32.mxu0 %v1835_v0  ;;  %v350_v60 = vrot.slane %v296_v50, %v2042_v27 }
  0x7c   : > { %1112 = vmatpush1.msra.mxu1 %v232_v61  ;;  %1585 = vmatmul.mubr.msk.f32.vlgmr.msra.gmra.mxu0 %vm438_vm0, %v1990_v13 }
  0x7d   : > { %1145 = vmatprep.mubr.f32.mxu1 %v1835_v0  ;;  %1178 = vmatprep.subr.mxu0 %v289_v62 }
  0x7e   : > { %1249 = vmatprep.subr.mxu1 %v291_v63  ;;  %1586 = vmatmul.mubr.msk.f32.vlgmr.msra.gmra.mxu1 %vm438_vm0, %v1990_v13 }
  0x7f   : > { %1179 = vmatpush1.msra.mxu0 %v288_v1  ;;  %1250 = vmatpush1.msra.mxu1 %v290_v2 }
  0x80   : > { %1180 = vmatprep.subr.mxu0 %v262_v3  ;;  %1251 = vmatprep.subr.mxu1 %v264_v4  ;;  %v354_v4 = vrot.slane %v296_v50, %v2048_v31 }
  0x81   : > { %1181 = vmatpush1.msra.mxu0 %v261_v5  ;;  %1252 = vmatpush1.msra.mxu1 %v263_v6  ;;  %v362_v5 = vrot.slane %v296_v50, %v2050_v36  ;;  %v358_v6 = vrot.slane %v296_v50, %v2052_v37 }
  0x82   : > { %1182 = vmatprep.subr.mxu0 %v235_v7  ;;  %1253 = vmatprep.subr.mxu1 %v237_v8 }
  0x83   : > { %1183 = vmatpush1.msra.mxu0 %v234_v9  ;;  %1216 = vmatprep.mubr.f32.mxu0 %v1835_v0  ;;  %v366_v9 = vrot.slane %v296_v50, %v2059_v42 }
  0x84   : > { %1254 = vmatpush1.msra.mxu1 %v236_v10  ;;  %1587 = vmatmul.mubr.msk.f32.vlgmr.msra.gmra.mxu0 %vm438_vm0, %v1990_v13 }
  0x85   : > { %1287 = vmatprep.mubr.f32.mxu1 %v1835_v0  ;;  %1320 = vmatprep.subr.mxu0 %v293_v11 }
  0x86   : > { %1598 = vmatprep.subr.mxu1 %v1835_v0  ;;  %1588 = vmatmul.mubr.msk.f32.vlgmr.msra.gmra.mxu1 %vm438_vm0, %v1990_v13 }
  0x87   : > { %1321 = vmatpush1.msra.mxu0 %v292_v12  ;;  %1599 = vmatpush3.msra.mxu1 %v294_v14  ;;  %v297_v12 = vld [vmem:[#allocation7 + $0x10] sm:$0xff] }
  0x88   : > { %1322 = vmatprep.subr.mxu0 %v266_v15  ;;  %1600 = vmatprep.subr.mxu1 %v1835_v0 }
  0x89   : > { %1323 = vmatpush1.msra.mxu0 %v265_v16  ;;  %1601 = vmatpush3.msra.mxu1 %v267_v17 }
  0x8a   : > { %1324 = vmatprep.subr.mxu0 %v239_v18  ;;  %1602 = vmatprep.subr.mxu1 %v1835_v0  ;;  %v370_v18 = vrot.slane %v297_v12, %v2035_v23 }
  0x8b   : > { %1325 = vmatpush1.msra.mxu0 %v238_v19  ;;  %1358 = vmatprep.mubr.f32.mxu0 %v1835_v0  ;;  %v378_v19 = vrot.slane %v297_v12, %v2037_v25 }
  0x8c   : > { %1603 = vmatpush3.msra.mxu1 %v240_v20  ;;  %1604 = vmatprep.mubr.msk.f32.mxu1 %vm1836_vm1, %v1835_v0  ;;  %v306_v0 = vrot.slane %v295_v24, %v2035_v23  ;;  %v374_v20 = vrot.slane %v297_v12, %v2039_v26 }
  0x8d   : > { %1589 = vmatmul.mubr.msk.f32.vlgmr.msra.gmra.mxu0 %vm438_vm0, %v1990_v13  ;;  %1605 = vmatmul.mubr.msk.f32.vlgmr.msra.gmra.mxu1 %vm438_vm0, %v1990_v13  ;;  %v318_v13 = vrot.slane %v295_v24, %v2042_v27  ;;  %v382_v24 = vrot.slane %v297_v12, %v2042_v27 }
 0x11d   : > { %v508_v30 = vpop.f32.mrf.mxu0 }
 0x11e   : > { %v509_v32 = vadd.f32 %v508_v30, %v306_v0  ;;  %v579_v33 = vpop.f32.mrf.mxu1 }
 0x11f   : > { %v580_v34 = vadd.f32 %v579_v33, %v314_v28  ;;  %v510_v35 = vpop.f32.mrf.mxu0  ;;  %v386_v33 = vrot.slane %v297_v12, %v2048_v31 }
 0x120   : > { %1435 = vst [vmem:[%s2054_s20] sm:$0xff] %v509_v32  ;;  %v511_v38 = vadd.f32 %v510_v35, %v310_v29  ;;  %v581_v39 = vpop.f32.mrf.mxu1  ;;  %v390_v35 = vrot.slane %v297_v12, %v2052_v37 }
 0x121   : > { %1437 = vst [vmem:[%s2054_s20 + $0x10] sm:$0xff] %v580_v34  ;;  %v582_v40 = vadd.f32 %v581_v39, %v318_v13  ;;  %v394_v34 = vrot.slane %v297_v12, %v2050_v36  ;;  %v398_v39 = vrot.slane %v297_v12, %v2059_v42 }
 0x122   : > { %1436 = vst [vmem:[%s2054_s20 + $0x8] sm:$0xff] %v511_v38 }
 0x123   : > { %1438 = vst [vmem:[%s2054_s20 + $0x18] sm:$0xff] %v582_v40 }
 0x124   : > { %v650_v45 = vpop.f32.mrf.mxu0 }
 0x125   : > { %v651_v46 = vadd.f32 %v650_v45, %v322_v41  ;;  %v298_v45 = vld [vmem:[#allocation7 + $0x18] sm:$0x7] }
 0x126   : > { %v721_v48 = vpop.f32.mrf.mxu1  ;;  %v652_v49 = vpop.f32.mrf.mxu0  ;;  %v402_v36 = vrot.slane %v298_v45, %v2035_v23  ;;  %v410_v37 = vrot.slane %v298_v45, %v2037_v25  ;;  %v406_v42 = vrot.slane %v298_v45, %v2039_v26 }
 0x127   : > { %1439 = vst [vmem:[%s2054_s20 + $0x20] sm:$0xff] %v651_v46  ;;  %v722_v51 = vadd.f32 %v721_v48, %v330_v43  ;;  %v653_v52 = vadd.f32 %v652_v49, %v326_v44 }
 0x128   : > { %v723_v53 = vpop.f32.mrf.mxu1 }
 0x129   : > { %1441 = vst [vmem:[%s2054_s20 + $0x30] sm:$0xff] %v722_v51  ;;  %1440 = vst [vmem:[%s2054_s20 + $0x28] sm:$0xff] %v653_v52  ;;  %v724_v54 = vadd.f32 %v723_v53, %v334_v47 }
 0x12b   : > { %1442 = vst [vmem:[%s2054_s20 + $0x38] sm:$0xff] %v724_v54 }
 0x12c   : > { %v792_v58 = vpop.f32.mrf.mxu0 }
 0x12d   : > { %v793_v59 = vadd.f32 %v792_v58, %v338_v55 }
 0x12e   : > { %v863_v61 = vpop.f32.mrf.mxu1  ;;  %v794_v62 = vpop.f32.mrf.mxu0 }
 0x12f   : > { %1443 = vst [vmem:[%s2054_s20 + $0x40] sm:$0xff] %v793_v59  ;;  %v864_v63 = vadd.f32 %v863_v61, %v346_v56  ;;  %v795_v1 = vadd.f32 %v794_v62, %v342_v57 }
 0x130   : > { %v865_v2 = vpop.f32.mrf.mxu1 }
 0x131   : > { %1445 = vst [vmem:[%s2054_s20 + $0x50] sm:$0xff] %v864_v63  ;;  %1444 = vst [vmem:[%s2054_s20 + $0x48] sm:$0xff] %v795_v1  ;;  %v866_v3 = vadd.f32 %v865_v2, %v350_v60 }
 0x133   : > { %1446 = vst [vmem:[%s2054_s20 + $0x58] sm:$0xff] %v866_v3 }
 0x134   : > { %v934_v7 = vpop.f32.mrf.mxu0 }
 0x135   : > { %v935_v8 = vadd.f32 %v934_v7, %v354_v4 }
 0x136   : > { %v1005_v10 = vpop.f32.mrf.mxu1  ;;  %v936_v11 = vpop.f32.mrf.mxu0 }
 0x137   : > { %1447 = vst [vmem:[%s2054_s20 + $0x60] sm:$0xff] %v935_v8  ;;  %v1006_v14 = vadd.f32 %v1005_v10, %v362_v5  ;;  %v937_v15 = vadd.f32 %v936_v11, %v358_v6 }
 0x138   : > { %v1007_v16 = vpop.f32.mrf.mxu1 }
 0x139   : > { %1449 = vst [vmem:[%s2054_s20 + $0x70] sm:$0xff] %v1006_v14  ;;  %1448 = vst [vmem:[%s2054_s20 + $0x68] sm:$0xff] %v937_v15  ;;  %v1008_v17 = vadd.f32 %v1007_v16, %v366_v9 }
 0x13b   : > { %1450 = vst [vmem:[%s2054_s20 + $0x78] sm:$0xff] %v1008_v17 }
 0x13c   : > { %v1076_v21 = vpop.f32.mrf.mxu0 }
 0x13d   : > { %v1077_v22 = vadd.f32 %v1076_v21, %v370_v18 }
 0x13e   : > { %v1147_v0 = vpop.f32.mrf.mxu1  ;;  %v1078_v28 = vpop.f32.mrf.mxu0 }
 0x13f   : > { %1451 = vst [vmem:[%s2054_s20 + $0x80] sm:$0xff] %v1077_v22  ;;  %v1148_v29 = vadd.f32 %v1147_v0, %v378_v19  ;;  %v1079_v30 = vadd.f32 %v1078_v28, %v374_v20 }
 0x140   : > { %v1149_v13 = vpop.f32.mrf.mxu1 }
 0x141   : > { %1453 = vst [vmem:[%s2054_s20 + $0x90] sm:$0xff] %v1148_v29  ;;  %1452 = vst [vmem:[%s2054_s20 + $0x88] sm:$0xff] %v1079_v30  ;;  %v1150_v32 = vadd.f32 %v1149_v13, %v382_v24 }
 0x143   : > { %1454 = vst [vmem:[%s2054_s20 + $0x98] sm:$0xff] %v1150_v32 }
 0x144   : > { %v1218_v27 = vpop.f32.mrf.mxu0 }
 0x145   : > { %v1219_v38 = vadd.f32 %v1218_v27, %v386_v33 }
 0x146   : > { %v1289_v40 = vpop.f32.mrf.mxu1  ;;  %v1220_v41 = vpop.f32.mrf.mxu0 }
 0x147   : > { %1455 = vst [vmem:[%s2054_s20 + $0xa0] sm:$0xff] %v1219_v38  ;;  %v1290_v43 = vadd.f32 %v1289_v40, %v394_v34  ;;  %v1221_v44 = vadd.f32 %v1220_v41, %v390_v35 }
 0x148   : > { %v1291_v46 = vpop.f32.mrf.mxu1 }
 0x149   : > { %1457 = vst [vmem:[%s2054_s20 + $0xb0] sm:$0xff] %v1290_v43  ;;  %1456 = vst [vmem:[%s2054_s20 + $0xa8] sm:$0xff] %v1221_v44  ;;  %v1292_v31 = vadd.f32 %v1291_v46, %v398_v39 }
 0x14b   : > { %1458 = vst [vmem:[%s2054_s20 + $0xb8] sm:$0xff] %v1292_v31 }
 0x14d   : > { %v1360_v47 = vpop.f32.mrf.mxu0  ;;  %v1431_v48 = vpop.f32.mrf.mxu1 }
 0x14e   : > { %v1361_v49 = vadd.f32 %v1360_v47, %v402_v36  ;;  %v1432_v50 = vadd.f32 %v1431_v48, %v410_v37 }
 0x14f   : > { %v1362_v51 = vpop.f32.mrf.mxu0  ;;  %v1606_v52 = vpop.f32.mrf.mxu1 }
 0x150   : > { %1459 = vst [vmem:[%s2054_s20 + $0xc0] sm:$0xff] %v1361_v49  ;;  %1461 = vst [vmem:[%s2054_s20 + $0xd0] sm:$0xff] %v1432_v50  ;;  %v1363_v53 = vadd.f32 %v1362_v51, %v406_v42 }
 0x152   : > { %1460 = vst [vmem:[%s2054_s20 + $0xc8] sm:$0xff] %v1363_v53 }
 0x153   : > { %1773 = shalt.err (!%p1770_p0)
}
 0x154   : > { %s1774_s21 = scalar_lea.hbm %s1475_s6, 3456  ;;  %s1778_s25 = scalar_lea.hbm %s2147_s3, 6912 }
 0x155   : > { %p1775_p5 = scmp.ne.s32.totalorder %s1475_s6, %s1774_s21  ;;  %p1779_p6 = scmp.lt.s32.totalorder %s1475_s6, %s2147_s3 }
 0x156   : > { %p1780_p4 = scmp.lt.s32.totalorder %s1778_s25, %s1774_s21 }
 0x157   : > { %p1776_p3 = pnand %p1775_p5, %p2163_p11 }
 0x158   : > { %p1781_p8 = por %p1780_p4, %p1779_p6 }
 0x159   : > { %p1777_p1 = pneg %p1776_p3 }
 0x15b   : > { %p1782_p9 = pnand %p1781_p8, %p1777_p1 }
 0x15d   : > { %1785 = shalt.err (!%p1782_p9)
}
 0x15e   : > { %1619 = dma.vmem_to_hbm [thread:$0]  (%p2163_p11), %s1478_s28, 3456, %s1475_s6, %s1463_s7  }
 0x15f PF: > { %s1489_s5 = sand.u32 1, %s1816_s12   ;;  %p2164_p10 = scmp.ne.s32.totalorder %s2153_s19, 0 }
 0x160   : > { %p2165_p2 = scmp.ge.s32.totalorder %s1828_s15, 2  ;;  %s1490_s18 = scalar_lea.sflag [#allocation4], %s1489_s5 }
 0x162   : > { %p1633_p12 = pnand %p2165_p2, %p2164_p10 }
 0x164   : > { %p1634_p7 = pneg %p1633_p12 }
 0x166   : > { %1811 = dma.done.wait (%p1634_p7), %s1490_s18, 3456  }
 0x167   : > { %1813 = vsyncadd (%p1634_p7), %s1490_s18, 4294963840  ;;  %p17_p13 = scmp.ge.s32.totalorder %s1930_s8, 4   ;;  %s2166_s12 = smov %s1820_s13 }
 0x168   : > { %s2167_s13 = smov %s1824_s14  ;;  %s2168_s14 = smov %s1946_s17 }
 0x169   : > { %s2169_s15 = smov %s1930_s8  ;;  %19 = sbr.rel (!%p17_p13) target bundleno = 6 (0x6), region = 85 }
 0x16e   :  { %1495 = vsyncpa [#allocation3], 1 }
 0x16f   :  { %1497 = vsyncpa [#allocation3 + $0x1], 1 }
 0x170   :  { %1498 = vsyncpa [#allocation6], 1 }
 0x171   :  { %1499 = vsyncpa [#allocation4], 1 }
 0x172   :  { %1501 = vsyncpa [#allocation4 + $0x1], 1 }

// kernel: tpu_custom_call.1
= control target key start
LH: loop header
LB: loop body
LE: loop exit
PB: predicated region body
PF: predicated region fallthrough
CT: control target
= control target key end

     0   :  { %8 = vsyncpa [#allocation3], 0  ;;  %s2144_s0 = inlined_call_operand.hbm [shape: f32[16,24], index: 0, kind: input, shape index: {}]   ;;  %s2145_s1 = inlined_call_operand.hbm [shape: f32[24,3456], index: 1, kind: input, shape index: {}]   ;;  %s2146_s2 = inlined_call_operand.hbm [shape: f32[1,3456], index: 2, kind: input, shape index: {}]   ;;  %s2147_s3 = inlined_call_operand.hbm [shape: f32[16,3456], index: 3, kind: output, shape index: {}]  }
   0x1   :  { %10 = vsyncpa [#allocation3 + $0x1], 0 }
   0x2   :  { %11 = vsyncpa [#allocation6], 0 }
   0x3   :  { %12 = vsyncpa [#allocation4], 0 }
   0x4   :  { %14 = vsyncpa [#allocation4 + $0x1], 0  ;;  %s1858_s12 = smov 0   ;;  %s1860_s13 = smov 0  }
   0x5   :  { %s1862_s14 = smov 0   ;;  %s1864_s15 = smov 0  }
   0x6 LB: > { %s1879_s16 = sadd.s32 4294967295, %s1828_s15   ;;  %s1566_s17 = sadd.s32 4294967294, %s1828_s15   ;;  %s1828_s15 = sphi %s1864_s15, %s2169_s15   ;;  %s1824_s14 = sphi %s1862_s14, %s2168_s14   ;;  %s1820_s13 = sphi %s1860_s13, %s2167_s13   ;;  %s1816_s12 = sphi %s1858_s12, %s2166_s12  }
   0x7   : > { %p40_p0 = scmp.ne.s32.totalorder %s1820_s13, %s1816_s12  ;;  %p2148_p1 = scmp.eq.s32.totalorder %s1879_s16, 0 }
   0x8   : > { %p112_p3 = scmp.eq.s32.totalorder %s1566_s17, 1  ;;  %p1567_p5 = scmp.ge.s32.totalorder %s1828_s15, 1 }
   0x9   : > { %p1888_p4 = por %p2148_p1, %p40_p0  ;;  %p119_p7 = scmp.lt.s32.totalorder %s1828_s15, 3 }
   0xa   : > { %p1893_p6 = por %p112_p3, %p40_p0  ;;  %s1830_s21 = smov [#allocation5]  }
   0xb   : > { %s2152_s18 = scalar_select %p1888_p4, 1, 0 }
   0xc   : > { %s2153_s19 = scalar_select %p1893_p6, 1, 0 }
   0xd   : > { %p1898_p8 = pnand %p1567_p5, %p119_p7  ;;  %s131_s22 = sshll.u32 %s1830_s21, 4  ;;  %s132_s22 = int_to_ptr.vmem [resolvable:$true] %s131_s22 }
   0xe   : > { %s1831_s24 = smov [#allocation7]   ;;  %s1691_s26 = scalar_lea.vmem %s132_s22, 10368 }
   0xf   : > { %s2154_s20 = scalar_select %p1898_p8, 1, 0 }
  0x10   : > { %p1621_p9 = pneg %p1898_p8  ;;  %s145_s25 = sshll.u32 %s1831_s24, 4  ;;  %s146_s25 = int_to_ptr.vmem [resolvable:$true] %s145_s25 }
  0x11   : > { %p1692_p13 = scmp.ne.s32.totalorder %s132_s22, %s1691_s26  ;;  %p1699_p5 = scmp.lt.s32.totalorder %s132_s22, %s132_s22 }
  0x12   : > { %p1907_p11 = pnand %p1621_p9, %p2148_p1  ;;  %p1700_p7 = scmp.lt.s32.totalorder %s1691_s26, %s1691_s26 }
  0x14   : > { %p1682_p12 = pneg %p1907_p11  ;;  %p1701_p10 = por %p1700_p7, %p1699_p5 }
  0x16   : > { %p1694_p0 = pnand %p1692_p13, %p1682_p12 }
  0x18   : > { %p1695_p3 = pneg %p1694_p0 }
  0x1a   : > { %p1702_p9 = pnand %p1701_p10, %p1695_p3 }
  0x1c   : > { %1705 = shalt.err (!%p1702_p9)
}
  0x1d   : > { %s1832_s27 = smov 3456   ;;  %s1833_s28 = smov 216  }
  0x1e   : > { %1624 = dma.hbm_to_vmem [thread:$0]  (!%p1907_p11), %s2145_s1, 10368, %s132_s22, [#allocation6], %s1832_s27, %s1832_s27, %s1833_s28  }
  0x1f   : > { %s1717_s4 = scalar_lea.vmem %s146_s25, 432  ;;  %s1724_s5 = scalar_lea.vmem %s146_s25, 448 }
  0x20   : > { %p1718_p1 = scmp.ne.s32.totalorder %s146_s25, %s1717_s4  ;;  %p1725_p2 = scmp.lt.s32.totalorder %s146_s25, %s146_s25 }
  0x21   : > { %p1726_p5 = scmp.lt.s32.totalorder %s1724_s5, %s1717_s4 }
  0x22   : > { %p1720_p13 = pnand %p1718_p1, %p1682_p12 }
  0x23   : > { %p1727_p10 = por %p1726_p5, %p1725_p2 }
  0x24   : > { %p1721_p0 = pneg %p1720_p13 }
  0x26   : > { %p1728_p3 = pnand %p1727_p10, %p1721_p0 }
  0x28   : > { %1731 = shalt.err (!%p1728_p3)
}
  0x29   : > { %1627 = dma.hbm_to_vmem [thread:$0]  (!%p1907_p11), %s2146_s2, 432, %s146_s25, [#allocation6]  }
  0x2a   : > { %s1930_s8 = sadd.s32 1, %s1828_s15   ;;  %s27_s9 = sadd.s32 1, %s1824_s14 }
  0x2b   : > { %s24_s10 = ssub.s32 %s1828_s15, %s1930_s8  ;;  %p34_p1 = scmp.ne.s32.totalorder %s1824_s14, %s1820_s13 }
  0x2c   : > { %p25_p2 = scmp.eq.s32.totalorder %s24_s10, 0  ;;  %p35_p12 = scmp.eq.s32.totalorder %s1828_s15, 0 }
  0x2d   : > { %p2156_p7 = scmp.eq.s32.totalorder %s1879_s16, 1  ;;  %p1638_p13 = scmp.lt.s32.totalorder %s1828_s15, 2 }
  0x2e   : > { %s1946_s17 = scalar_select %p25_p2, %s1824_s14, %s27_s9  }
  0x2f   : > { %p1940_p9 = por %p2156_p7, %p34_p1  ;;  %p36_p0 = por %p35_p12, %p34_p1 }
  0x30   : > { %s156_s21 = sand.u32 1, %s1824_s14   ;;  %s1572_s23 = sshll.u32 %s1828_s15, 7 }
  0x31   : > { %s2157_s11 = scalar_select %p1940_p9, 1, 0 }
  0x32   : > { %s1571_s22 = sshll.u32 %s156_s21, 3  ;;  %s1953_s26 = scalar_lea.hbm %s2144_s0, %s1572_s23 }
  0x33   : > { %s160_s27 = scalar_lea.vmem [#allocation2], %s1571_s22  ;;  %p1955_p11 = pnand %p1638_p13, %p36_p0 }
  0x34   : > { %s167_s28 = sshll.u32 %s160_s27, 4  ;;  %s157_s30 = scalar_lea.sflag [#allocation3], %s156_s21  ;;  %s168_s28 = int_to_ptr.vmem [resolvable:$true] %s167_s28 }
  0x35   : > { %s1732_s4 = scalar_lea.hbm %s1953_s26, 128  ;;  %p1734_p10 = pneg %p1955_p11 }
  0x36   : > { %p1733_p5 = scmp.ne.s32.totalorder %s1953_s26, %s1732_s4  ;;  %s1737_s7 = scalar_lea.hbm %s2144_s0, 256 }
  0x37   : > { %p1738_p2 = scmp.lt.s32.totalorder %s1953_s26, %s2144_s0  ;;  %p1739_p12 = scmp.lt.s32.totalorder %s1737_s7, %s1732_s4 }
  0x38   : > { %p1735_p3 = pnand %p1734_p10, %p1733_p5 }
  0x39   : > { %p1740_p7 = por %p1739_p12, %p1738_p2 }
  0x3a   : > { %p1736_p1 = pneg %p1735_p3 }
  0x3c   : > { %p1741_p13 = pnand %p1740_p7, %p1736_p1 }
  0x3e   : > { %1744 = shalt.err (!%p1741_p13)
}
  0x3f   : > { %s1745_s22 = scalar_lea.vmem %s168_s28, 128  ;;  %s1834_s21 = smov [#allocation2]  }
  0x40   : > { %p1746_p0 = scmp.ne.s32.totalorder %s168_s28, %s1745_s22  ;;  %s1750_s23 = sshll.u32 %s1834_s21, 4  ;;  %s1751_s23 = int_to_ptr.vmem [resolvable:$false] %s1750_s23 }
  0x41   : > { %s1752_s24 = scalar_lea.vmem %s1751_s23, 256  ;;  %p1753_p5 = scmp.lt.s32.totalorder %s168_s28, %s1751_s23 }
  0x42   : > { %p1748_p6 = pnand %p1746_p0, %p1734_p10  ;;  %p1754_p3 = scmp.lt.s32.totalorder %s1752_s24, %s1745_s22 }
  0x44   : > { %p1749_p9 = pneg %p1748_p6  ;;  %p1755_p4 = por %p1754_p3, %p1753_p5 }
  0x46   : > { %p1756_p8 = pnand %p1755_p4, %p1749_p9 }
  0x48   : > { %1759 = shalt.err (!%p1756_p8)
}
  0x49   : > { %1631 = dma.hbm_to_vmem [thread:$0]  (!%p1955_p11), %s1953_s26, 128, %s168_s28, %s157_s30  }
  0x4a   : > { %p2159_p1 = scmp.ne.s32.totalorder %s2154_s20, 0 }
  0x4b   : > { %s1976_s25 = sand.u32 (!%p2159_p1), 1, %s1820_s13   ;;  %p2160_p6 = scmp.ne.s32.totalorder (!%p2159_p1), %s2152_s18, 0 }
  0x4c   : > { %176 = sbr.rel (%p2159_p1) target bundleno = 351 (0x15f), region = 32  ;;  %s1574_s27 = sshll.u32 (!%p2159_p1), %s1976_s25, 3 }
  0x4d   : > { %s179_s4 = scalar_lea.sflag (!%p2159_p1), [#allocation3], %s1976_s25  ;;  %s182_s5 = scalar_lea.vmem (!%p2159_p1), [#allocation2], %s1574_s27 }
  0x51   : > { %1803 = dma.done.wait (%p2160_p6), %s179_s4, 128  }
  0x52   : > { %1805 = vsyncadd (%p2160_p6), %s179_s4, 4294967168  ;;  %p2161_p4 = scmp.eq.s32.totalorder %s1879_s16, 0 }
  0x54   : > { %1807 = dma.done.wait (%p2161_p4), [#allocation6], 10800   ;;  %p2162_p8 = pmov %p2161_p4 }
  0x55   : > { %v1835_v0 = vmov 0.0   ;;  %v269_v1 = vld [vmem:[#allocation5 + $0x1b8] sm:$0xff]  ;;  %v271_v2 = vld [vmem:[#allocation5 + $0x1c8] sm:$0xff]  ;;  %v268_v3 = vld [vmem:[#allocation5 + $0x1b0] sm:$0xff]  ;;  %vm438_vm0 = vcmask 195584   ;;  %vm1836_vm1 = vmmov 0  }
  0x56   : > { %1809 = vsyncadd (%p2162_p8), [#allocation6], 4294956496  ;;  %506 = vmatprep.mubr.f32.mxu0 %v1835_v0  ;;  %577 = vmatprep.mubr.f32.mxu1 %v1835_v0  ;;  %v270_v4 = vld [vmem:[#allocation5 + $0x1c0] sm:$0xff]  ;;  %v244_v6 = vld [vmem:[#allocation5 + $0xf0] sm:$0xff]  ;;  %s1607_s18 = smul.u32 216, %s1976_s25  ;;  %s1463_s7 = scalar_lea.sflag [#allocation4], %s1976_s25 }
  0x57   : > { %468 = vmatprep.subr.mxu0 %v269_v1  ;;  %539 = vmatprep.subr.mxu1 %v271_v2  ;;  %v242_v5 = vld [vmem:[#allocation5 + $0xe0] sm:$0xff]  ;;  %v241_v7 = vld [vmem:[#allocation5 + $0xd8] sm:$0xff]  ;;  %v243_v8 = vld [vmem:[#allocation5 + $0xe8] sm:$0xff]  ;;  %s1608_s26 = smul.u32 3456, %s1879_s16  ;;  %p2163_p11 = scmp.ne.s32.totalorder %s2157_s11, 0 }
  0x58   : > { %469 = vmatpush1.msra.mxu0 %v268_v3  ;;  %540 = vmatpush1.msra.mxu1 %v270_v4  ;;  %v215_v9 = vld [vmem:[#allocation5 + $0x8] sm:$0xff]  ;;  %v217_v10 = vld [vmem:[#allocation5 + $0x18] sm:$0xff]  ;;  %v214_v11 = vld [vmem:[#allocation5] sm:$0xff]  ;;  %s2054_s20 = scalar_lea.vmem [#allocation8], %s1607_s18  ;;  %s1837_s16 = smov [#allocation8]  }
  0x59   : > { %470 = vmatprep.subr.mxu0 %v242_v5  ;;  %541 = vmatprep.subr.mxu1 %v244_v6  ;;  %v216_v12 = vld [vmem:[#allocation5 + $0x10] sm:$0xff]  ;;  %v273_v14 = vld [vmem:[#allocation5 + $0x1d8] sm:$0xff]  ;;  %v275_v15 = vld [vmem:[#allocation5 + $0x1e8] sm:$0xff]  ;;  %s1477_s28 = sshll.u32 %s2054_s20, 4  ;;  %s1475_s6 = scalar_lea.hbm %s2147_s3, %s1608_s26  ;;  %s1478_s28 = int_to_ptr.vmem [resolvable:$true] %s1477_s28 }
  0x5a   : > { %471 = vmatpush1.msra.mxu0 %v241_v7  ;;  %542 = vmatpush1.msra.mxu1 %v243_v8  ;;  %v1990_v13 = vld [vmem:[%s182_s5] sm:$0xff]  ;;  %v274_v17 = vld [vmem:[#allocation5 + $0x1e0] sm:$0xff]  ;;  %v247_v21 = vld [vmem:[#allocation5 + $0x108] sm:$0xff]  ;;  %s1760_s9 = scalar_lea.vmem %s1478_s28, 3456  ;;  %s1764_s10 = sshll.u32 %s1837_s16, 4  ;;  %s1765_s10 = int_to_ptr.vmem [resolvable:$false] %s1764_s10 }
  0x5b   : > { %472 = vmatprep.subr.mxu0 %v215_v9  ;;  %543 = vmatprep.subr.mxu1 %v217_v10  ;;  %v272_v16 = vld [vmem:[#allocation5 + $0x1d0] sm:$0xff]  ;;  %v246_v18 = vld [vmem:[#allocation5 + $0x100] sm:$0xff]  ;;  %v245_v20 = vld [vmem:[#allocation5 + $0xf8] sm:$0xff]  ;;  %p1761_p9 = scmp.ne.s32.totalorder %s1478_s28, %s1760_s9  ;;  %s1766_s22 = scalar_lea.vmem %s1765_s10, 6912 }
  0x5c   : > { %473 = vmatpush1.msra.mxu0 %v214_v11  ;;  %544 = vmatpush1.msra.mxu1 %v216_v12  ;;  %v248_v19 = vld [vmem:[#allocation5 + $0x110] sm:$0xff]  ;;  %v219_v22 = vld [vmem:[#allocation5 + $0x28] sm:$0xff]  ;;  %v221_v23 = vld [vmem:[#allocation5 + $0x38] sm:$0xff]  ;;  %p1767_p12 = scmp.lt.s32.totalorder %s1478_s28, %s1765_s10  ;;  %p1768_p7 = scmp.lt.s32.totalorder %s1766_s22, %s1760_s9 }
  0x5d   : > { %1577 = vmatmul.mubr.msk.f32.vlgmr.msra.gmra.mxu0 %vm438_vm0, %v1990_v13  ;;  %610 = vmatprep.subr.mxu0 %v273_v14  ;;  %v218_v24 = vld [vmem:[#allocation5 + $0x20] sm:$0xff]  ;;  %v220_v25 = vld [vmem:[#allocation5 + $0x30] sm:$0xff]  ;;  %v277_v26 = vld [vmem:[#allocation5 + $0x1f8] sm:$0xff]  ;;  %p1762_p10 = pnand %p1761_p9, %p2163_p11 }
  0x5e   : > { %681 = vmatprep.subr.mxu1 %v275_v15  ;;  %1578 = vmatmul.mubr.msk.f32.vlgmr.msra.gmra.mxu1 %vm438_vm0, %v1990_v13  ;;  %v279_v27 = vld [vmem:[#allocation5 + $0x208] sm:$0xff]  ;;  %v276_v28 = vld [vmem:[#allocation5 + $0x1f0] sm:$0xff]  ;;  %v278_v29 = vld [vmem:[#allocation5 + $0x200] sm:$0xff]  ;;  %p1769_p13 = por %p1768_p7, %p1767_p12 }
  0x5f   : > { %611 = vmatpush1.msra.mxu0 %v272_v16  ;;  %682 = vmatpush1.msra.mxu1 %v274_v17  ;;  %v250_v30 = vld [vmem:[#allocation5 + $0x120] sm:$0xff]  ;;  %v252_v31 = vld [vmem:[#allocation5 + $0x130] sm:$0xff]  ;;  %v249_v32 = vld [vmem:[#allocation5 + $0x118] sm:$0xff]  ;;  %p1763_p2 = pneg %p1762_p10 }
  0x60   : > { %612 = vmatprep.subr.mxu0 %v246_v18  ;;  %683 = vmatprep.subr.mxu1 %v248_v19  ;;  %v251_v33 = vld [vmem:[#allocation5 + $0x128] sm:$0xff]  ;;  %v225_v35 = vld [vmem:[#allocation5 + $0x58] sm:$0xff]  ;;  %v222_v36 = vld [vmem:[#allocation5 + $0x40] sm:$0xff] }
  0x61   : > { %613 = vmatpush1.msra.mxu0 %v245_v20  ;;  %684 = vmatpush1.msra.mxu1 %v247_v21  ;;  %v223_v34 = vld [vmem:[#allocation5 + $0x48] sm:$0xff]  ;;  %v224_v37 = vld [vmem:[#allocation5 + $0x50] sm:$0xff]  ;;  %v281_v38 = vld [vmem:[#allocation5 + $0x218] sm:$0xff]  ;;  %v303_v21 = vlaneseq  ;;  %p1770_p0 = pnand %p1769_p13, %p1763_p2 }
  0x62   : > { %614 = vmatprep.subr.mxu0 %v219_v22  ;;  %685 = vmatprep.subr.mxu1 %v221_v23  ;;  %v283_v39 = vld [vmem:[#allocation5 + $0x228] sm:$0xff]  ;;  %v280_v40 = vld [vmem:[#allocation5 + $0x210] sm:$0xff]  ;;  %v282_v41 = vld [vmem:[#allocation5 + $0x220] sm:$0xff] }
  0x63   : > { %615 = vmatpush1.msra.mxu0 %v218_v24  ;;  %648 = vmatprep.mubr.f32.mxu0 %v1835_v0  ;;  %v254_v42 = vld [vmem:[#allocation5 + $0x140] sm:$0xff]  ;;  %v256_v43 = vld [vmem:[#allocation5 + $0x150] sm:$0xff]  ;;  %v253_v44 = vld [vmem:[#allocation5 + $0x138] sm:$0xff]  ;;  %v304_v22 = vshrl.u32 %v303_v21, 7 }
  0x64   : > { %686 = vmatpush1.msra.mxu1 %v220_v25  ;;  %1579 = vmatmul.mubr.msk.f32.vlgmr.msra.gmra.mxu0 %vm438_vm0, %v1990_v13  ;;  %v255_v45 = vld [vmem:[#allocation5 + $0x148] sm:$0xff]  ;;  %v229_v47 = vld [vmem:[#allocation5 + $0x78] sm:$0xff]  ;;  %v226_v48 = vld [vmem:[#allocation5 + $0x60] sm:$0xff] }
  0x65   : > { %719 = vmatprep.mubr.f32.mxu1 %v1835_v0  ;;  %752 = vmatprep.subr.mxu0 %v277_v26  ;;  %v227_v46 = vld [vmem:[#allocation5 + $0x68] sm:$0xff]  ;;  %v228_v49 = vld [vmem:[#allocation5 + $0x70] sm:$0xff]  ;;  %v285_v50 = vld [vmem:[#allocation5 + $0x238] sm:$0xff]  ;;  %v2035_v23 = vsub.s32 0, %v304_v22  ;;  %v2037_v25 = vsub.s32 2, %v304_v22  ;;  %v2039_v26 = vsub.s32 1, %v304_v22 }
  0x66   : > { %823 = vmatprep.subr.mxu1 %v279_v27  ;;  %1580 = vmatmul.mubr.msk.f32.vlgmr.msra.gmra.mxu1 %vm438_vm0, %v1990_v13  ;;  %v287_v51 = vld [vmem:[#allocation5 + $0x248] sm:$0xff]  ;;  %v284_v52 = vld [vmem:[#allocation5 + $0x230] sm:$0xff]  ;;  %v286_v53 = vld [vmem:[#allocation5 + $0x240] sm:$0xff]  ;;  %v2042_v27 = vsub.s32 3, %v304_v22 }
  0x67   : > { %753 = vmatpush1.msra.mxu0 %v276_v28  ;;  %824 = vmatpush1.msra.mxu1 %v278_v29  ;;  %v258_v54 = vld [vmem:[#allocation5 + $0x160] sm:$0xff]  ;;  %v260_v55 = vld [vmem:[#allocation5 + $0x170] sm:$0xff]  ;;  %v257_v56 = vld [vmem:[#allocation5 + $0x158] sm:$0xff] }
  0x68   : > { %754 = vmatprep.subr.mxu0 %v250_v30  ;;  %825 = vmatprep.subr.mxu1 %v252_v31  ;;  %v259_v57 = vld [vmem:[#allocation5 + $0x168] sm:$0xff]  ;;  %v233_v59 = vld [vmem:[#allocation5 + $0x98] sm:$0xff]  ;;  %v230_v60 = vld [vmem:[#allocation5 + $0x80] sm:$0xff]  ;;  %v2048_v31 = vsub.s32 4, %v304_v22 }
  0x69   : > { %755 = vmatpush1.msra.mxu0 %v249_v32  ;;  %826 = vmatpush1.msra.mxu1 %v251_v33  ;;  %v231_v58 = vld [vmem:[#allocation5 + $0x88] sm:$0xff]  ;;  %v232_v61 = vld [vmem:[#allocation5 + $0x90] sm:$0xff]  ;;  %v289_v62 = vld [vmem:[#allocation5 + $0x258] sm:$0xff] }
  0x6a   : > { %756 = vmatprep.subr.mxu0 %v223_v34  ;;  %827 = vmatprep.subr.mxu1 %v225_v35  ;;  %v291_v63 = vld [vmem:[#allocation5 + $0x268] sm:$0xff]  ;;  %v288_v1 = vld [vmem:[#allocation5 + $0x250] sm:$0xff]  ;;  %v290_v2 = vld [vmem:[#allocation5 + $0x260] sm:$0xff] }
  0x6b   : > { %757 = vmatpush1.msra.mxu0 %v222_v36  ;;  %790 = vmatprep.mubr.f32.mxu0 %v1835_v0  ;;  %v262_v3 = vld [vmem:[#allocation5 + $0x180] sm:$0xff]  ;;  %v264_v4 = vld [vmem:[#allocation5 + $0x190] sm:$0xff]  ;;  %v261_v5 = vld [vmem:[#allocation5 + $0x178] sm:$0xff]  ;;  %v2050_v36 = vsub.s32 6, %v304_v22 }
  0x6c   : > { %828 = vmatpush1.msra.mxu1 %v224_v37  ;;  %1581 = vmatmul.mubr.msk.f32.vlgmr.msra.gmra.mxu0 %vm438_vm0, %v1990_v13  ;;  %v263_v6 = vld [vmem:[#allocation5 + $0x188] sm:$0xff]  ;;  %v237_v8 = vld [vmem:[#allocation5 + $0xb8] sm:$0xff]  ;;  %v234_v9 = vld [vmem:[#allocation5 + $0xa0] sm:$0xff]  ;;  %v2052_v37 = vsub.s32 5, %v304_v22 }
  0x6d   : > { %861 = vmatprep.mubr.f32.mxu1 %v1835_v0  ;;  %894 = vmatprep.subr.mxu0 %v281_v38  ;;  %v235_v7 = vld [vmem:[#allocation5 + $0xa8] sm:$0xff]  ;;  %v236_v10 = vld [vmem:[#allocation5 + $0xb0] sm:$0xff]  ;;  %v293_v11 = vld [vmem:[#allocation5 + $0x278] sm:$0xff] }
  0x6e   : > { %965 = vmatprep.subr.mxu1 %v283_v39  ;;  %1582 = vmatmul.mubr.msk.f32.vlgmr.msra.gmra.mxu1 %vm438_vm0, %v1990_v13  ;;  %v292_v12 = vld [vmem:[#allocation5 + $0x270] sm:$0xff]  ;;  %v294_v14 = vld [vmem:[#allocation5 + $0x280] sm:$0xff]  ;;  %v265_v16 = vld [vmem:[#allocation5 + $0x198] sm:$0xff] }
  0x6f   : > { %895 = vmatpush1.msra.mxu0 %v280_v40  ;;  %966 = vmatpush1.msra.mxu1 %v282_v41  ;;  %v266_v15 = vld [vmem:[#allocation5 + $0x1a0] sm:$0xff]  ;;  %v267_v17 = vld [vmem:[#allocation5 + $0x1a8] sm:$0xff]  ;;  %v240_v20 = vld [vmem:[#allocation5 + $0xd0] sm:$0xff] }
  0x70   : > { %896 = vmatprep.subr.mxu0 %v254_v42  ;;  %967 = vmatprep.subr.mxu1 %v256_v43  ;;  %v239_v18 = vld [vmem:[#allocation5 + $0xc8] sm:$0xff]  ;;  %v238_v19 = vld [vmem:[#allocation5 + $0xc0] sm:$0xff]  ;;  %v2059_v42 = vsub.s32 7, %v304_v22 }
  0x71   : > { %897 = vmatpush1.msra.mxu0 %v253_v44  ;;  %968 = vmatpush1.msra.mxu1 %v255_v45  ;;  %v295_v24 = vld [vmem:[#allocation7] sm:$0xff] }
  0x72   : > { %898 = vmatprep.subr.mxu0 %v227_v46  ;;  %969 = vmatprep.subr.mxu1 %v229_v47  ;;  %v314_v28 = vrot.slane %v295_v24, %v2037_v25  ;;  %v310_v29 = vrot.slane %v295_v24, %v2039_v26  ;;  %v322_v41 = vrot.slane %v295_v24, %v2048_v31 }
  0x73   : > { %899 = vmatpush1.msra.mxu0 %v226_v48  ;;  %932 = vmatprep.mubr.f32.mxu0 %v1835_v0  ;;  %v330_v43 = vrot.slane %v295_v24, %v2050_v36  ;;  %v326_v44 = vrot.slane %v295_v24, %v2052_v37  ;;  %v334_v47 = vrot.slane %v295_v24, %v2059_v42 }
  0x74   : > { %970 = vmatpush1.msra.mxu1 %v228_v49  ;;  %1583 = vmatmul.mubr.msk.f32.vlgmr.msra.gmra.mxu0 %vm438_vm0, %v1990_v13 }
  0x75   : > { %1003 = vmatprep.mubr.f32.mxu1 %v1835_v0  ;;  %1036 = vmatprep.subr.mxu0 %v285_v50  ;;  %v296_v50 = vld [vmem:[#allocation7 + $0x8] sm:$0xff] }
  0x76   : > { %1107 = vmatprep.subr.mxu1 %v287_v51  ;;  %1584 = vmatmul.mubr.msk.f32.vlgmr.msra.gmra.mxu1 %vm438_vm0, %v1990_v13 }
  0x77   : > { %1037 = vmatpush1.msra.mxu0 %v284_v52  ;;  %1108 = vmatpush1.msra.mxu1 %v286_v53 }
  0x78   : > { %1038 = vmatprep.subr.mxu0 %v258_v54  ;;  %1109 = vmatprep.subr.mxu1 %v260_v55  ;;  %v338_v55 = vrot.slane %v296_v50, %v2035_v23 }
  0x79   : > { %1039 = vmatpush1.msra.mxu0 %v257_v56  ;;  %1110 = vmatpush1.msra.mxu1 %v259_v57  ;;  %v346_v56 = vrot.slane %v296_v50, %v2037_v25  ;;  %v342_v57 = vrot.slane %v296_v50, %v2039_v26 }
  0x7a   : > { %1040 = vmatprep.subr.mxu0 %v231_v58  ;;  %1111 = vmatprep.subr.mxu1 %v233_v59 }
  0x7b   : > { %1041 = vmatpush1.msra.mxu0 %v230_v60  ;;  %1074 = vmatprep.mubr.f32.mxu0 %v1835_v0  ;;  %v350_v60 = vrot.slane %v296_v50, %v2042_v27 }
  0x7c   : > { %1112 = vmatpush1.msra.mxu1 %v232_v61  ;;  %1585 = vmatmul.mubr.msk.f32.vlgmr.msra.gmra.mxu0 %vm438_vm0, %v1990_v13 }
  0x7d   : > { %1145 = vmatprep.mubr.f32.mxu1 %v1835_v0  ;;  %1178 = vmatprep.subr.mxu0 %v289_v62 }
  0x7e   : > { %1249 = vmatprep.subr.mxu1 %v291_v63  ;;  %1586 = vmatmul.mubr.msk.f32.vlgmr.msra.gmra.mxu1 %vm438_vm0, %v1990_v13 }
  0x7f   : > { %1179 = vmatpush1.msra.mxu0 %v288_v1  ;;  %1250 = vmatpush1.msra.mxu1 %v290_v2 }
  0x80   : > { %1180 = vmatprep.subr.mxu0 %v262_v3  ;;  %1251 = vmatprep.subr.mxu1 %v264_v4  ;;  %v354_v4 = vrot.slane %v296_v50, %v2048_v31 }
  0x81   : > { %1181 = vmatpush1.msra.mxu0 %v261_v5  ;;  %1252 = vmatpush1.msra.mxu1 %v263_v6  ;;  %v362_v5 = vrot.slane %v296_v50, %v2050_v36  ;;  %v358_v6 = vrot.slane %v296_v50, %v2052_v37 }
  0x82   : > { %1182 = vmatprep.subr.mxu0 %v235_v7  ;;  %1253 = vmatprep.subr.mxu1 %v237_v8 }
  0x83   : > { %1183 = vmatpush1.msra.mxu0 %v234_v9  ;;  %1216 = vmatprep.mubr.f32.mxu0 %v1835_v0  ;;  %v366_v9 = vrot.slane %v296_v50, %v2059_v42 }
  0x84   : > { %1254 = vmatpush1.msra.mxu1 %v236_v10  ;;  %1587 = vmatmul.mubr.msk.f32.vlgmr.msra.gmra.mxu0 %vm438_vm0, %v1990_v13 }
  0x85   : > { %1287 = vmatprep.mubr.f32.mxu1 %v1835_v0  ;;  %1320 = vmatprep.subr.mxu0 %v293_v11 }
  0x86   : > { %1598 = vmatprep.subr.mxu1 %v1835_v0  ;;  %1588 = vmatmul.mubr.msk.f32.vlgmr.msra.gmra.mxu1 %vm438_vm0, %v1990_v13 }
  0x87   : > { %1321 = vmatpush1.msra.mxu0 %v292_v12  ;;  %1599 = vmatpush3.msra.mxu1 %v294_v14  ;;  %v297_v12 = vld [vmem:[#allocation7 + $0x10] sm:$0xff] }
  0x88   : > { %1322 = vmatprep.subr.mxu0 %v266_v15  ;;  %1600 = vmatprep.subr.mxu1 %v1835_v0 }
  0x89   : > { %1323 = vmatpush1.msra.mxu0 %v265_v16  ;;  %1601 = vmatpush3.msra.mxu1 %v267_v17 }
  0x8a   : > { %1324 = vmatprep.subr.mxu0 %v239_v18  ;;  %1602 = vmatprep.subr.mxu1 %v1835_v0  ;;  %v370_v18 = vrot.slane %v297_v12, %v2035_v23 }
  0x8b   : > { %1325 = vmatpush1.msra.mxu0 %v238_v19  ;;  %1358 = vmatprep.mubr.f32.mxu0 %v1835_v0  ;;  %v378_v19 = vrot.slane %v297_v12, %v2037_v25 }
  0x8c   : > { %1603 = vmatpush3.msra.mxu1 %v240_v20  ;;  %1604 = vmatprep.mubr.msk.f32.mxu1 %vm1836_vm1, %v1835_v0  ;;  %v306_v0 = vrot.slane %v295_v24, %v2035_v23  ;;  %v374_v20 = vrot.slane %v297_v12, %v2039_v26 }
  0x8d   : > { %1589 = vmatmul.mubr.msk.f32.vlgmr.msra.gmra.mxu0 %vm438_vm0, %v1990_v13  ;;  %1605 = vmatmul.mubr.msk.f32.vlgmr.msra.gmra.mxu1 %vm438_vm0, %v1990_v13  ;;  %v318_v13 = vrot.slane %v295_v24, %v2042_v27  ;;  %v382_v24 = vrot.slane %v297_v12, %v2042_v27 }
 0x11d   : > { %v508_v30 = vpop.f32.mrf.mxu0 }
 0x11e   : > { %v509_v32 = vadd.f32 %v508_v30, %v306_v0  ;;  %v579_v33 = vpop.f32.mrf.mxu1 }
 0x11f   : > { %v580_v34 = vadd.f32 %v579_v33, %v314_v28  ;;  %v510_v35 = vpop.f32.mrf.mxu0  ;;  %v386_v33 = vrot.slane %v297_v12, %v2048_v31 }
 0x120   : > { %1435 = vst [vmem:[%s2054_s20] sm:$0xff] %v509_v32  ;;  %v511_v38 = vadd.f32 %v510_v35, %v310_v29  ;;  %v581_v39 = vpop.f32.mrf.mxu1  ;;  %v390_v35 = vrot.slane %v297_v12, %v2052_v37 }
 0x121   : > { %1437 = vst [vmem:[%s2054_s20 + $0x10] sm:$0xff] %v580_v34  ;;  %v582_v40 = vadd.f32 %v581_v39, %v318_v13  ;;  %v394_v34 = vrot.slane %v297_v12, %v2050_v36  ;;  %v398_v39 = vrot.slane %v297_v12, %v2059_v42 }
 0x122   : > { %1436 = vst [vmem:[%s2054_s20 + $0x8] sm:$0xff] %v511_v38 }
 0x123   : > { %1438 = vst [vmem:[%s2054_s20 + $0x18] sm:$0xff] %v582_v40 }
 0x124   : > { %v650_v45 = vpop.f32.mrf.mxu0 }
 0x125   : > { %v651_v46 = vadd.f32 %v650_v45, %v322_v41  ;;  %v298_v45 = vld [vmem:[#allocation7 + $0x18] sm:$0x7] }
 0x126   : > { %v721_v48 = vpop.f32.mrf.mxu1  ;;  %v652_v49 = vpop.f32.mrf.mxu0  ;;  %v402_v36 = vrot.slane %v298_v45, %v2035_v23  ;;  %v410_v37 = vrot.slane %v298_v45, %v2037_v25  ;;  %v406_v42 = vrot.slane %v298_v45, %v2039_v26 }
 0x127   : > { %1439 = vst [vmem:[%s2054_s20 + $0x20] sm:$0xff] %v651_v46  ;;  %v722_v51 = vadd.f32 %v721_v48, %v330_v43  ;;  %v653_v52 = vadd.f32 %v652_v49, %v326_v44 }
 0x128   : > { %v723_v53 = vpop.f32.mrf.mxu1 }
 0x129   : > { %1441 = vst [vmem:[%s2054_s20 + $0x30] sm:$0xff] %v722_v51  ;;  %1440 = vst [vmem:[%s2054_s20 + $0x28] sm:$0xff] %v653_v52  ;;  %v724_v54 = vadd.f32 %v723_v53, %v334_v47 }
 0x12b   : > { %1442 = vst [vmem:[%s2054_s20 + $0x38] sm:$0xff] %v724_v54 }
 0x12c   : > { %v792_v58 = vpop.f32.mrf.mxu0 }
 0x12d   : > { %v793_v59 = vadd.f32 %v792_v58, %v338_v55 }
 0x12e   : > { %v863_v61 = vpop.f32.mrf.mxu1  ;;  %v794_v62 = vpop.f32.mrf.mxu0 }
 0x12f   : > { %1443 = vst [vmem:[%s2054_s20 + $0x40] sm:$0xff] %v793_v59  ;;  %v864_v63 = vadd.f32 %v863_v61, %v346_v56  ;;  %v795_v1 = vadd.f32 %v794_v62, %v342_v57 }
 0x130   : > { %v865_v2 = vpop.f32.mrf.mxu1 }
 0x131   : > { %1445 = vst [vmem:[%s2054_s20 + $0x50] sm:$0xff] %v864_v63  ;;  %1444 = vst [vmem:[%s2054_s20 + $0x48] sm:$0xff] %v795_v1  ;;  %v866_v3 = vadd.f32 %v865_v2, %v350_v60 }
 0x133   : > { %1446 = vst [vmem:[%s2054_s20 + $0x58] sm:$0xff] %v866_v3 }
 0x134   : > { %v934_v7 = vpop.f32.mrf.mxu0 }
 0x135   : > { %v935_v8 = vadd.f32 %v934_v7, %v354_v4 }
 0x136   : > { %v1005_v10 = vpop.f32.mrf.mxu1  ;;  %v936_v11 = vpop.f32.mrf.mxu0 }
 0x137   : > { %1447 = vst [vmem:[%s2054_s20 + $0x60] sm:$0xff] %v935_v8  ;;  %v1006_v14 = vadd.f32 %v1005_v10, %v362_v5  ;;  %v937_v15 = vadd.f32 %v936_v11, %v358_v6 }
 0x138   : > { %v1007_v16 = vpop.f32.mrf.mxu1 }
 0x139   : > { %1449 = vst [vmem:[%s2054_s20 + $0x70] sm:$0xff] %v1006_v14  ;;  %1448 = vst [vmem:[%s2054_s20 + $0x68] sm:$0xff] %v937_v15  ;;  %v1008_v17 = vadd.f32 %v1007_v16, %v366_v9 }
 0x13b   : > { %1450 = vst [vmem:[%s2054_s20 + $0x78] sm:$0xff] %v1008_v17 }
 0x13c   : > { %v1076_v21 = vpop.f32.mrf.mxu0 }
 0x13d   : > { %v1077_v22 = vadd.f32 %v1076_v21, %v370_v18 }
 0x13e   : > { %v1147_v0 = vpop.f32.mrf.mxu1  ;;  %v1078_v28 = vpop.f32.mrf.mxu0 }
 0x13f   : > { %1451 = vst [vmem:[%s2054_s20 + $0x80] sm:$0xff] %v1077_v22  ;;  %v1148_v29 = vadd.f32 %v1147_v0, %v378_v19  ;;  %v1079_v30 = vadd.f32 %v1078_v28, %v374_v20 }
 0x140   : > { %v1149_v13 = vpop.f32.mrf.mxu1 }
 0x141   : > { %1453 = vst [vmem:[%s2054_s20 + $0x90] sm:$0xff] %v1148_v29  ;;  %1452 = vst [vmem:[%s2054_s20 + $0x88] sm:$0xff] %v1079_v30  ;;  %v1150_v32 = vadd.f32 %v1149_v13, %v382_v24 }
 0x143   : > { %1454 = vst [vmem:[%s2054_s20 + $0x98] sm:$0xff] %v1150_v32 }
 0x144   : > { %v1218_v27 = vpop.f32.mrf.mxu0 }
 0x145   : > { %v1219_v38 = vadd.f32 %v1218_v27, %v386_v33 }
 0x146   : > { %v1289_v40 = vpop.f32.mrf.mxu1  ;;  %v1220_v41 = vpop.f32.mrf.mxu0 }
 0x147   : > { %1455 = vst [vmem:[%s2054_s20 + $0xa0] sm:$0xff] %v1219_v38  ;;  %v1290_v43 = vadd.f32 %v1289_v40, %v394_v34  ;;  %v1221_v44 = vadd.f32 %v1220_v41, %v390_v35 }
 0x148   : > { %v1291_v46 = vpop.f32.mrf.mxu1 }
 0x149   : > { %1457 = vst [vmem:[%s2054_s20 + $0xb0] sm:$0xff] %v1290_v43  ;;  %1456 = vst [vmem:[%s2054_s20 + $0xa8] sm:$0xff] %v1221_v44  ;;  %v1292_v31 = vadd.f32 %v1291_v46, %v398_v39 }
 0x14b   : > { %1458 = vst [vmem:[%s2054_s20 + $0xb8] sm:$0xff] %v1292_v31 }
 0x14d   : > { %v1360_v47 = vpop.f32.mrf.mxu0  ;;  %v1431_v48 = vpop.f32.mrf.mxu1 }
 0x14e   : > { %v1361_v49 = vadd.f32 %v1360_v47, %v402_v36  ;;  %v1432_v50 = vadd.f32 %v1431_v48, %v410_v37 }
 0x14f   : > { %v1362_v51 = vpop.f32.mrf.mxu0  ;;  %v1606_v52 = vpop.f32.mrf.mxu1 }
 0x150   : > { %1459 = vst [vmem:[%s2054_s20 + $0xc0] sm:$0xff] %v1361_v49  ;;  %1461 = vst [vmem:[%s2054_s20 + $0xd0] sm:$0xff] %v1432_v50  ;;  %v1363_v53 = vadd.f32 %v1362_v51, %v406_v42 }
 0x152   : > { %1460 = vst [vmem:[%s2054_s20 + $0xc8] sm:$0xff] %v1363_v53 }
 0x153   : > { %1773 = shalt.err (!%p1770_p0)
}
 0x154   : > { %s1774_s21 = scalar_lea.hbm %s1475_s6, 3456  ;;  %s1778_s25 = scalar_lea.hbm %s2147_s3, 6912 }
 0x155   : > { %p1775_p5 = scmp.ne.s32.totalorder %s1475_s6, %s1774_s21  ;;  %p1779_p6 = scmp.lt.s32.totalorder %s1475_s6, %s2147_s3 }
 0x156   : > { %p1780_p4 = scmp.lt.s32.totalorder %s1778_s25, %s1774_s21 }
 0x157   : > { %p1776_p3 = pnand %p1775_p5, %p2163_p11 }
 0x158   : > { %p1781_p8 = por %p1780_p4, %p1779_p6 }
 0x159   : > { %p1777_p1 = pneg %p1776_p3 }
 0x15b   : > { %p1782_p9 = pnand %p1781_p8, %p1777_p1 }
 0x15d   : > { %1785 = shalt.err (!%p1782_p9)
}
 0x15e   : > { %1619 = dma.vmem_to_hbm [thread:$0]  (%p2163_p11), %s1478_s28, 3456, %s1475_s6, %s1463_s7  }
 0x15f PF: > { %s1489_s5 = sand.u32 1, %s1816_s12   ;;  %p2164_p10 = scmp.ne.s32.totalorder %s2153_s19, 0 }
 0x160   : > { %p2165_p2 = scmp.ge.s32.totalorder %s1828_s15, 2  ;;  %s1490_s18 = scalar_lea.sflag [#allocation4], %s1489_s5 }
 0x162   : > { %p1633_p12 = pnand %p2165_p2, %p2164_p10 }
 0x164   : > { %p1634_p7 = pneg %p1633_p12 }
 0x166   : > { %1811 = dma.done.wait (%p1634_p7), %s1490_s18, 3456  }
 0x167   : > { %1813 = vsyncadd (%p1634_p7), %s1490_s18, 4294963840  ;;  %p17_p13 = scmp.ge.s32.totalorder %s1930_s8, 4   ;;  %s2166_s12 = smov %s1820_s13 }
 0x168   : > { %s2167_s13 = smov %s1824_s14  ;;  %s2168_s14 = smov %s1946_s17 }
 0x169   : > { %s2169_s15 = smov %s1930_s8  ;;  %19 = sbr.rel (!%p17_p13) target bundleno = 6 (0x6), region = 85 }
 0x16e   :  { %1495 = vsyncpa [#allocation3], 1 }
 0x16f   :  { %1497 = vsyncpa [#allocation3 + $0x1], 1 }
 0x170   :  { %1498 = vsyncpa [#allocation6], 1 }
 0x171   :  { %1499 = vsyncpa [#allocation4], 1 }
 0x172   :  { %1501 = vsyncpa [#allocation4 + $0x1], 1 }

</bundles_post_ra>
